<compile_context>
chip_gen: v7x
topology: tpu7x:2x2x1
jax: 0.10.0
libtpu: 0.0.40
codegen_flags: <defaults>
</compile_context>

<pallas_src>
import functools
import math

import jax
import jax.numpy as jnp
from jax import lax
from jax.experimental import pallas as pl
from jax.experimental.pallas import tpu as pltpu

# Resident, single-copy VMEM spec for weights (no per-step double buffering).
_WEIGHT_SPEC = pl.BlockSpec(memory_space=pltpu.MemorySpace.VMEM)


def _layer_norm(x, gamma, beta, eps):
    mu = jnp.mean(x, axis=-1, keepdims=True)
    d = x - mu
    var = jnp.mean(d * d, axis=-1, keepdims=True)
    return d * lax.rsqrt(var + eps) * gamma + beta


# ------------------------ fused encoder-layer kernel ------------------------

def _encoder_layer_kernel(*refs, nhead, eps, bt, need_weights, fuse_final_ln):
    (x_ref, in_w_ref, in_b_ref, out_w_ref, out_b_ref,
     g1_ref, be1_ref, w1_ref, b1_ref, w2_ref, b2_ref,
     g2_ref, be2_ref) = refs[:13]
    i = 13
    if fuse_final_ln:
        g3_ref, be3_ref = refs[i], refs[i + 1]
        i += 2
    o_ref = refs[i]
    wts_ref = refs[i + 1] if need_weights else None

    S = x_ref.shape[0]
    D = x_ref.shape[2]
    dh = D // nhead
    scale = 1.0 / math.sqrt(dh)

    # ---- gather the Bt sequences into one token slab [Bt*S, D] (b-major rows) ----
    x3 = x_ref[...]                                        # [S, Bt, D], f32
    tok = jnp.concatenate([x3[:, b, :] for b in range(bt)], axis=0)  # [Bt*S, D]

    # ---- fused in-projection: q,k,v in one MXU matmul (bf16 in, f32 accumulate) ----
    qkv = jnp.dot(tok.astype(jnp.bfloat16), in_w_ref[...],
                  preferred_element_type=jnp.float32) + in_b_ref[...]   # [Bt*S, 3D]

    # ---- per-batch, per-head attention; out-projection accumulated per head ----
    attn_blocks = []
    for b in range(bt):
        qkv_b = qkv[b * S:(b + 1) * S, :]                  # contiguous row block
        q = qkv_b[:, 0 * D:1 * D]
        k = qkv_b[:, 1 * D:2 * D]
        v = qkv_b[:, 2 * D:3 * D]
        attn_b = jnp.zeros((S, D), jnp.float32)
        wsum = jnp.zeros((S, S), jnp.float32)
        for h in range(nhead):
            # NOTE: dh-wide lane slices are only sub-128 at these toy shapes; at
            # realistic head_dim (>=128) they are lane-aligned.
            qh = q[:, h * dh:(h + 1) * dh].astype(jnp.bfloat16)
            kh = k[:, h * dh:(h + 1) * dh].astype(jnp.bfloat16)
            vh = v[:, h * dh:(h + 1) * dh].astype(jnp.bfloat16)
            # contract last axes directly (no explicit k.T)
            s_mat = lax.dot_general(qh, kh, (((1,), (1,)), ((), ())),
                                    preferred_element_type=jnp.float32) * scale
            m = jnp.max(s_mat, axis=-1, keepdims=True)
            e = jnp.exp(s_mat - m)
            denom = jnp.sum(e, axis=-1, keepdims=True)
            r = pl.reciprocal(denom, approx=True)          # EUP slot
            r = r * (2.0 - denom * r)                      # one Newton step (f32 acc.)
            p = e * r
            if need_weights:
                wsum = wsum + p
            ctx = jnp.dot(p.astype(jnp.bfloat16), vh,
                          preferred_element_type=jnp.float32)          # [S, dh]
            # accumulate out-projection per head: no lane-concat of head contexts
            attn_b = attn_b + jnp.dot(
                ctx.astype(jnp.bfloat16), out_w_ref[h * dh:(h + 1) * dh, :],
                preferred_element_type=jnp.float32)
        if need_weights:
            wts_ref[b] = wsum * (1.0 / nhead)              # head-averaged, in-kernel
        attn_blocks.append(attn_b)

    attn = attn_blocks[0] if bt == 1 else jnp.concatenate(attn_blocks, axis=0)
    attn = attn + out_b_ref[...]                           # [Bt*S, D]

    # ---- add & norm 1 (f32) ----
    h1 = _layer_norm(tok + attn, g1_ref[...], be1_ref[...], eps)

    # ---- feed-forward (ReLU fused), bf16 MXU / f32 accumulate ----
    ff = jnp.dot(h1.astype(jnp.bfloat16), w1_ref[...],
                 preferred_element_type=jnp.float32) + b1_ref[...]
    ff = jnp.maximum(ff, 0.0)
    ff = jnp.dot(ff.astype(jnp.bfloat16), w2_ref[...],
                 preferred_element_type=jnp.float32) + b2_ref[...]

    # ---- add & norm 2 ----
    y = _layer_norm(h1 + ff, g2_ref[...], be2_ref[...], eps)

    # ---- fused final encoder norm (last layer only) ----
    if fuse_final_ln:
        y = _layer_norm(y, g3_ref[...], be3_ref[...], eps)

    # ---- scatter the token slab back to the [S, Bt, D] output block ----
    y3 = jnp.stack([y[b * S:(b + 1) * S, :] for b in range(bt)], axis=1)
    o_ref[...] = y3


# ------------------------------ layer wrapper --------------------------------

def _pick_bt(B, S, target_tokens=256):
    """Largest divisor of B (<= B) so that bt*S is near target_tokens tokens/step."""
    want = max(1, -(-target_tokens // S))
    bt = max(1, min(B, want))
    while B % bt != 0:
        bt -= 1
    return bt


def encoder_layer_forward(x_sbd, p, nhead, *, eps=1e-5, final_norm=None,
                          need_weights=True, target_tokens=256):
    """x_sbd: [S, B, D] -> (out [S, B, D], attn weights [B, S, S]).  One pallas_call."""
    S, B, D = x_sbd.shape
    assert D % nhead == 0
    FF = p["w1_t"].shape[1]
    bt = _pick_bt(B, S, target_tokens)
    fuse_final_ln = final_norm is not None

    inputs = [x_sbd, p["in_w_t"], p["in_b"], p["out_w_t"], p["out_b"],
              p["g1"], p["be1"], p["w1_t"], p["b1"], p["w2_t"], p["b2"],
              p["g2"], p["be2"]]
    in_specs = [pl.BlockSpec((S, bt, D), lambda b: (0, b, 0))] + [_WEIGHT_SPEC] * 12
    if fuse_final_ln:
        inputs += [final_norm["g"], final_norm["be"]]
        in_specs += [_WEIGHT_SPEC, _WEIGHT_SPEC]

    out_shape = [jax.ShapeDtypeStruct((S, B, D), jnp.float32)]
    out_specs = [pl.BlockSpec((S, bt, D), lambda b: (0, b, 0))]
    if need_weights:
        out_shape.append(jax.ShapeDtypeStruct((B, S, S), jnp.float32))
        out_specs.append(pl.BlockSpec((bt, S, S), lambda b: (b, 0, 0)))

    # Explicit VMEM budget: resident (single-buffered) weights + double-buffered
    # activation blocks + temporaries, with generous headroom.
    weight_bytes = sum(int(a.size) * a.dtype.itemsize for a in inputs[1:])
    act_bytes = 2 * 2 * (S * bt * D * 4)                       # x + out blocks, 2-buffered
    wts_bytes = 2 * (bt * S * S * 4) if need_weights else 0
    tmp_bytes = 4 * (S * bt * max(3 * D, FF) * 4) + 4 * (S * S * 4)
    vmem_limit = int(min(max(2 * (weight_bytes + act_bytes + wts_bytes + tmp_bytes),
                             32 * 1024 * 1024), 100 * 1024 * 1024))

    outs = pl.pallas_call(
        functools.partial(_encoder_layer_kernel, nhead=nhead, eps=eps, bt=bt,
                          need_weights=need_weights, fuse_final_ln=fuse_final_ln),
        out_shape=tuple(out_shape),
        grid=(B // bt,),
        in_specs=in_specs,
        out_specs=tuple(out_specs),
        compiler_params=pltpu.CompilerParams(
            dimension_semantics=("parallel",),
            vmem_limit_bytes=vmem_limit),
    )(*inputs)
    if need_weights:
        return outs[0], outs[1]
    return outs[0], None


# ----------------------------- encoder stack --------------------------------

def transformer_encoder_forward(src, layer_params, final_norm, nhead):
    """src: [S, B, D] -> (out [S, B, D], [per-layer attn weights [B, S, S]])."""
    x = src                                   # stays [S, B, D]; no boundary transposes
    weights = []
    n = len(layer_params)
    for i, p in enumerate(layer_params):
        fuse = final_norm if (i == n - 1) else None   # fuse final LN into last layer
        x, w = encoder_layer_forward(x, p, nhead, final_norm=fuse)
        weights.append(w)
    return x, weights


# ------------------------------- param init ---------------------------------

def init_layer_params(key, d_model, dim_ff):
    ks = jax.random.split(key, 6)
    s = 0.05
    in_w = jax.random.normal(ks[0], (3 * d_model, d_model), jnp.float32) * s
    out_w = jax.random.normal(ks[1], (d_model, d_model), jnp.float32) * s
    w1 = jax.random.normal(ks[2], (dim_ff, d_model), jnp.float32) * s
    w2 = jax.random.normal(ks[3], (d_model, dim_ff), jnp.float32) * s
    in_b = jax.random.normal(ks[4], (3 * d_model,), jnp.float32) * s
    b_misc = jax.random.normal(ks[5], (2 * d_model + dim_ff,), jnp.float32) * s
    return {
        # matmul operands in bf16 (2x MXU throughput, half the resident VMEM);
        # accumulation stays f32 via preferred_element_type.
        "in_w_t": in_w.T.astype(jnp.bfloat16),              # [D, 3D]
        "out_w_t": out_w.T.astype(jnp.bfloat16),            # [D, D]
        "w1_t": w1.T.astype(jnp.bfloat16),                  # [D, F]
        "w2_t": w2.T.astype(jnp.bfloat16),                  # [F, D]
        # biases / LN params stay f32 (elementwise path; v5e VPU/EUP have no bf16)
        "in_b": in_b.reshape(1, 3 * d_model),
        "out_b": b_misc[:d_model].reshape(1, d_model),
        "b1": b_misc[d_model:d_model + dim_ff].reshape(1, dim_ff),
        "b2": b_misc[d_model + dim_ff:].reshape(1, d_model),
        "g1": jnp.ones((1, d_model), jnp.float32),
        "be1": jnp.zeros((1, d_model), jnp.float32),
        "g2": jnp.ones((1, d_model), jnp.float32),
        "be2": jnp.zeros((1, d_model), jnp.float32),
    }


# ---------------------------------- main -------------------------------------

if __name__ == "__main__":
    S, B, D = 8, 2, 32          # seq, batch, d_model
    NHEAD, FF, LAYERS = 4, 64, 2

    root = jax.random.PRNGKey(0)
    k_src, *k_layers = jax.random.split(root, LAYERS + 1)

    src = jax.random.normal(k_src, (S, B, D), jnp.float32)
    layer_params = [init_layer_params(k, D, FF) for k in k_layers]
    final_norm = {"g": jnp.ones((1, D), jnp.float32),
                  "be": jnp.zeros((1, D), jnp.float32)}

    out, weights = transformer_encoder_forward(src, layer_params, final_norm, NHEAD)
    out = jax.block_until_ready(out)
    weights = [jax.block_until_ready(w) for w in weights]

    assert out.shape == (S, B, D)
    assert len(weights) == LAYERS and all(w.shape == (B, S, S) for w in weights)
    # attention rows must sum to 1 (softmax + head average)
    assert bool(jnp.allclose(jnp.sum(weights[0], axis=-1), 1.0, atol=1e-4))
    assert bool(jnp.all(jnp.isfinite(out)))
    print("KERNEL_OK")
</pallas_src>

<mosaic_0001>
module attributes {stable_mosaic.version = 11 : i64} {
  func.func @_encoder_layer_kernel(%arg0: i32, %arg1: memref<8x2x32xf32, #tpu.memory_space<vmem>>, %arg2: memref<32x96xbf16, #tpu.memory_space<vmem>>, %arg3: memref<1x96xf32, #tpu.memory_space<vmem>>, %arg4: memref<32x32xbf16, #tpu.memory_space<vmem>>, %arg5: memref<1x32xf32, #tpu.memory_space<vmem>>, %arg6: memref<1x32xf32, #tpu.memory_space<vmem>>, %arg7: memref<1x32xf32, #tpu.memory_space<vmem>>, %arg8: memref<32x64xbf16, #tpu.memory_space<vmem>>, %arg9: memref<1x64xf32, #tpu.memory_space<vmem>>, %arg10: memref<64x32xbf16, #tpu.memory_space<vmem>>, %arg11: memref<1x32xf32, #tpu.memory_space<vmem>>, %arg12: memref<1x32xf32, #tpu.memory_space<vmem>>, %arg13: memref<1x32xf32, #tpu.memory_space<vmem>>, %arg14: memref<8x2x32xf32, #tpu.memory_space<vmem>>, %arg15: memref<2x8x8xf32, #tpu.memory_space<vmem>>) attributes {dimension_semantics = [#tpu.dimension_semantics<parallel>], iteration_bounds = array<i64: 1>, scalar_prefetch = 0 : i64, scratch_operands = 0 : i64, tpu.core_type = #tpu.core_type<tc>, window_params = [{transform_indices = @transform_0, window_bounds = array<i64: 8, 2, 32>}, {pipeline_mode = #tpu.pipeline_mode<synchronous>, transform_indices = @transform_1, window_bounds = array<i64: 32, 96>}, {pipeline_mode = #tpu.pipeline_mode<synchronous>, transform_indices = @transform_2, window_bounds = array<i64: 1, 96>}, {pipeline_mode = #tpu.pipeline_mode<synchronous>, transform_indices = @transform_3, window_bounds = array<i64: 32, 32>}, {pipeline_mode = #tpu.pipeline_mode<synchronous>, transform_indices = @transform_4, window_bounds = array<i64: 1, 32>}, {pipeline_mode = #tpu.pipeline_mode<synchronous>, transform_indices = @transform_5, window_bounds = array<i64: 1, 32>}, {pipeline_mode = #tpu.pipeline_mode<synchronous>, transform_indices = @transform_6, window_bounds = array<i64: 1, 32>}, {pipeline_mode = #tpu.pipeline_mode<synchronous>, transform_indices = @transform_7, window_bounds = array<i64: 32, 64>}, {pipeline_mode = #tpu.pipeline_mode<synchronous>, transform_indices = @transform_8, window_bounds = array<i64: 1, 64>}, {pipeline_mode = #tpu.pipeline_mode<synchronous>, transform_indices = @transform_9, window_bounds = array<i64: 64, 32>}, {pipeline_mode = #tpu.pipeline_mode<synchronous>, transform_indices = @transform_10, window_bounds = array<i64: 1, 32>}, {pipeline_mode = #tpu.pipeline_mode<synchronous>, transform_indices = @transform_11, window_bounds = array<i64: 1, 32>}, {pipeline_mode = #tpu.pipeline_mode<synchronous>, transform_indices = @transform_12, window_bounds = array<i64: 1, 32>}, {transform_indices = @transform_13, window_bounds = array<i64: 8, 2, 32>}, {transform_indices = @transform_14, window_bounds = array<i64: 2, 8, 8>}]} {
    %c0 = arith.constant 0 : index
    %c0_0 = arith.constant 0 : index
    %c0_1 = arith.constant 0 : index
    %0 = vector.load %arg1[%c0, %c0_0, %c0_1] : memref<8x2x32xf32, #tpu.memory_space<vmem>>, vector<8x2x32xf32>
    %1 = vector.extract_strided_slice %0 {offsets = [0, 0, 0], sizes = [8, 1, 32], strides = [1, 1, 1]} : vector<8x2x32xf32> to vector<8x1x32xf32>
    %2 = vector.shape_cast %1 : vector<8x1x32xf32> to vector<8x32xf32>
    %3 = vector.extract_strided_slice %0 {offsets = [0, 1, 0], sizes = [8, 1, 32], strides = [1, 1, 1]} : vector<8x2x32xf32> to vector<8x1x32xf32>
    %4 = vector.shape_cast %3 : vector<8x1x32xf32> to vector<8x32xf32>
    %5 = tpu.concatenate %2, %4 in 0 : vector<8x32xf32>, vector<8x32xf32> -> vector<16x32xf32>
    %6 = arith.truncf %5 : vector<16x32xf32> to vector<16x32xbf16>
    %c0_2 = arith.constant 0 : index
    %c0_3 = arith.constant 0 : index
    %7 = vector.load %arg2[%c0_2, %c0_3] : memref<32x96xbf16, #tpu.memory_space<vmem>>, vector<32x96xbf16>
    %cst = arith.constant dense<0.000000e+00> : vector<16x96xf32>
    %8 = tpu.matmul %6, %7, %cst {dimension_numbers = #tpu.dot_dimension_numbers<[1], [0], [0], [1], [0, 0, 1, 1], [], []>} : vector<16x32xbf16>, vector<32x96xbf16>, vector<16x96xf32> -> vector<16x96xf32>
    %c0_4 = arith.constant 0 : index
    %c0_5 = arith.constant 0 : index
    %9 = vector.load %arg3[%c0_4, %c0_5] : memref<1x96xf32, #tpu.memory_space<vmem>>, vector<1x96xf32>
    %10 = vector.broadcast %9 : vector<1x96xf32> to vector<16x96xf32>
    %11 = arith.addf %8, %10 : vector<16x96xf32>
    %12 = vector.extract_strided_slice %11 {offsets = [0, 0], sizes = [8, 96], strides = [1, 1]} : vector<16x96xf32> to vector<8x96xf32>
    %13 = vector.extract_strided_slice %12 {offsets = [0, 0], sizes = [8, 32], strides = [1, 1]} : vector<8x96xf32> to vector<8x32xf32>
    %14 = vector.extract_strided_slice %12 {offsets = [0, 32], sizes = [8, 32], strides = [1, 1]} : vector<8x96xf32> to vector<8x32xf32>
    %15 = vector.extract_strided_slice %12 {offsets = [0, 64], sizes = [8, 32], strides = [1, 1]} : vector<8x96xf32> to vector<8x32xf32>
    %cst_6 = arith.constant 0.000000e+00 : f32
    %16 = vector.broadcast %cst_6 : f32 to vector<8x32xf32>
    %cst_7 = arith.constant 0.000000e+00 : f32
    %17 = vector.broadcast %cst_7 : f32 to vector<8x8xf32>
    %18 = vector.extract_strided_slice %13 {offsets = [0, 0], sizes = [8, 8], strides = [1, 1]} : vector<8x32xf32> to vector<8x8xf32>
    %19 = arith.truncf %18 : vector<8x8xf32> to vector<8x8xbf16>
    %20 = vector.extract_strided_slice %14 {offsets = [0, 0], sizes = [8, 8], strides = [1, 1]} : vector<8x32xf32> to vector<8x8xf32>
    %21 = arith.truncf %20 : vector<8x8xf32> to vector<8x8xbf16>
    %22 = vector.extract_strided_slice %15 {offsets = [0, 0], sizes = [8, 8], strides = [1, 1]} : vector<8x32xf32> to vector<8x8xf32>
    %23 = arith.truncf %22 : vector<8x8xf32> to vector<8x8xbf16>
    %cst_8 = arith.constant dense<0.000000e+00> : vector<8x8xf32>
    %24 = tpu.matmul %19, %21, %cst_8 {dimension_numbers = #tpu.dot_dimension_numbers<[1], [1], [0], [0], [0, 0, 1, 0], [], []>} : vector<8x8xbf16>, vector<8x8xbf16>, vector<8x8xf32> -> vector<8x8xf32>
    %cst_9 = arith.constant 0.353553385 : f32
    %25 = vector.broadcast %cst_9 : f32 to vector<8x8xf32>
    %26 = arith.mulf %24, %25 : vector<8x8xf32>
    %cst_10 = arith.constant dense<0xFF800000> : vector<8xf32>
    %27 = vector.multi_reduction <maximumf>, %26, %cst_10 [1] : vector<8x8xf32> to vector<8xf32>
    %28 = vector.shape_cast %27 : vector<8xf32> to vector<8x1xf32>
    %29 = vector.broadcast %28 : vector<8x1xf32> to vector<8x8xf32>
    %30 = arith.subf %26, %29 : vector<8x8xf32>
    %31 = math.exp %30 : vector<8x8xf32>
    %cst_11 = arith.constant dense<0.000000e+00> : vector<8xf32>
    %32 = vector.multi_reduction <add>, %31, %cst_11 [1] : vector<8x8xf32> to vector<8xf32>
    %33 = vector.shape_cast %32 : vector<8xf32> to vector<8x1xf32>
    %34 = tpu.reciprocal %33 {approx = true} : vector<8x1xf32> -> vector<8x1xf32>
    %35 = arith.mulf %33, %34 : vector<8x1xf32>
    %cst_12 = arith.constant 2.000000e+00 : f32
    %36 = vector.broadcast %cst_12 : f32 to vector<8x1xf32>
    %37 = arith.subf %36, %35 : vector<8x1xf32>
    %38 = arith.mulf %34, %37 : vector<8x1xf32>
    %39 = vector.broadcast %38 : vector<8x1xf32> to vector<8x8xf32>
    %40 = arith.mulf %31, %39 : vector<8x8xf32>
    %41 = arith.addf %17, %40 : vector<8x8xf32>
    %42 = arith.truncf %40 : vector<8x8xf32> to vector<8x8xbf16>
    %cst_13 = arith.constant dense<0.000000e+00> : vector<8x8xf32>
    %43 = tpu.matmul %42, %23, %cst_13 {dimension_numbers = #tpu.dot_dimension_numbers<[1], [0], [0], [1], [0, 0, 1, 1], [], []>} : vector<8x8xbf16>, vector<8x8xbf16>, vector<8x8xf32> -> vector<8x8xf32>
    %44 = arith.truncf %43 : vector<8x8xf32> to vector<8x8xbf16>
    %c0_14 = arith.constant 0 : index
    %c0_15 = arith.constant 0 : index
    %45 = vector.load %arg4[%c0_14, %c0_15] : memref<32x32xbf16, #tpu.memory_space<vmem>>, vector<8x32xbf16>
    %cst_16 = arith.constant dense<0.000000e+00> : vector<8x32xf32>
    %46 = tpu.matmul %44, %45, %cst_16 {dimension_numbers = #tpu.dot_dimension_numbers<[1], [0], [0], [1], [0, 0, 1, 1], [], []>} : vector<8x8xbf16>, vector<8x32xbf16>, vector<8x32xf32> -> vector<8x32xf32>
    %47 = arith.addf %16, %46 : vector<8x32xf32>
    %48 = vector.extract_strided_slice %13 {offsets = [0, 8], sizes = [8, 8], strides = [1, 1]} : vector<8x32xf32> to vector<8x8xf32>
    %49 = arith.truncf %48 : vector<8x8xf32> to vector<8x8xbf16>
    %50 = vector.extract_strided_slice %14 {offsets = [0, 8], sizes = [8, 8], strides = [1, 1]} : vector<8x32xf32> to vector<8x8xf32>
    %51 = arith.truncf %50 : vector<8x8xf32> to vector<8x8xbf16>
    %52 = vector.extract_strided_slice %15 {offsets = [0, 8], sizes = [8, 8], strides = [1, 1]} : vector<8x32xf32> to vector<8x8xf32>
    %53 = arith.truncf %52 : vector<8x8xf32> to vector<8x8xbf16>
    %cst_17 = arith.constant dense<0.000000e+00> : vector<8x8xf32>
    %54 = tpu.matmul %49, %51, %cst_17 {dimension_numbers = #tpu.dot_dimension_numbers<[1], [1], [0], [0], [0, 0, 1, 0], [], []>} : vector<8x8xbf16>, vector<8x8xbf16>, vector<8x8xf32> -> vector<8x8xf32>
    %cst_18 = arith.constant 0.353553385 : f32
    %55 = vector.broadcast %cst_18 : f32 to vector<8x8xf32>
    %56 = arith.mulf %54, %55 : vector<8x8xf32>
    %cst_19 = arith.constant dense<0xFF800000> : vector<8xf32>
    %57 = vector.multi_reduction <maximumf>, %56, %cst_19 [1] : vector<8x8xf32> to vector<8xf32>
    %58 = vector.shape_cast %57 : vector<8xf32> to vector<8x1xf32>
    %59 = vector.broadcast %58 : vector<8x1xf32> to vector<8x8xf32>
    %60 = arith.subf %56, %59 : vector<8x8xf32>
    %61 = math.exp %60 : vector<8x8xf32>
    %cst_20 = arith.constant dense<0.000000e+00> : vector<8xf32>
    %62 = vector.multi_reduction <add>, %61, %cst_20 [1] : vector<8x8xf32> to vector<8xf32>
    %63 = vector.shape_cast %62 : vector<8xf32> to vector<8x1xf32>
    %64 = tpu.reciprocal %63 {approx = true} : vector<8x1xf32> -> vector<8x1xf32>
    %65 = arith.mulf %63, %64 : vector<8x1xf32>
    %cst_21 = arith.constant 2.000000e+00 : f32
    %66 = vector.broadcast %cst_21 : f32 to vector<8x1xf32>
    %67 = arith.subf %66, %65 : vector<8x1xf32>
    %68 = arith.mulf %64, %67 : vector<8x1xf32>
    %69 = vector.broadcast %68 : vector<8x1xf32> to vector<8x8xf32>
    %70 = arith.mulf %61, %69 : vector<8x8xf32>
    %71 = arith.addf %41, %70 : vector<8x8xf32>
    %72 = arith.truncf %70 : vector<8x8xf32> to vector<8x8xbf16>
    %cst_22 = arith.constant dense<0.000000e+00> : vector<8x8xf32>
    %73 = tpu.matmul %72, %53, %cst_22 {dimension_numbers = #tpu.dot_dimension_numbers<[1], [0], [0], [1], [0, 0, 1, 1], [], []>} : vector<8x8xbf16>, vector<8x8xbf16>, vector<8x8xf32> -> vector<8x8xf32>
    %74 = arith.truncf %73 : vector<8x8xf32> to vector<8x8xbf16>
    %c8 = arith.constant 8 : index
    %c0_23 = arith.constant 0 : index
    %75 = vector.load %arg4[%c8, %c0_23] : memref<32x32xbf16, #tpu.memory_space<vmem>>, vector<8x32xbf16>
    %cst_24 = arith.constant dense<0.000000e+00> : vector<8x32xf32>
    %76 = tpu.matmul %74, %75, %cst_24 {dimension_numbers = #tpu.dot_dimension_numbers<[1], [0], [0], [1], [0, 0, 1, 1], [], []>} : vector<8x8xbf16>, vector<8x32xbf16>, vector<8x32xf32> -> vector<8x32xf32>
    %77 = arith.addf %47, %76 : vector<8x32xf32>
    %78 = vector.extract_strided_slice %13 {offsets = [0, 16], sizes = [8, 8], strides = [1, 1]} : vector<8x32xf32> to vector<8x8xf32>
    %79 = arith.truncf %78 : vector<8x8xf32> to vector<8x8xbf16>
    %80 = vector.extract_strided_slice %14 {offsets = [0, 16], sizes = [8, 8], strides = [1, 1]} : vector<8x32xf32> to vector<8x8xf32>
    %81 = arith.truncf %80 : vector<8x8xf32> to vector<8x8xbf16>
    %82 = vector.extract_strided_slice %15 {offsets = [0, 16], sizes = [8, 8], strides = [1, 1]} : vector<8x32xf32> to vector<8x8xf32>
    %83 = arith.truncf %82 : vector<8x8xf32> to vector<8x8xbf16>
    %cst_25 = arith.constant dense<0.000000e+00> : vector<8x8xf32>
    %84 = tpu.matmul %79, %81, %cst_25 {dimension_numbers = #tpu.dot_dimension_numbers<[1], [1], [0], [0], [0, 0, 1, 0], [], []>} : vector<8x8xbf16>, vector<8x8xbf16>, vector<8x8xf32> -> vector<8x8xf32>
    %cst_26 = arith.constant 0.353553385 : f32
    %85 = vector.broadcast %cst_26 : f32 to vector<8x8xf32>
    %86 = arith.mulf %84, %85 : vector<8x8xf32>
    %cst_27 = arith.constant dense<0xFF800000> : vector<8xf32>
    %87 = vector.multi_reduction <maximumf>, %86, %cst_27 [1] : vector<8x8xf32> to vector<8xf32>
    %88 = vector.shape_cast %87 : vector<8xf32> to vector<8x1xf32>
    %89 = vector.broadcast %88 : vector<8x1xf32> to vector<8x8xf32>
    %90 = arith.subf %86, %89 : vector<8x8xf32>
    %91 = math.exp %90 : vector<8x8xf32>
    %cst_28 = arith.constant dense<0.000000e+00> : vector<8xf32>
    %92 = vector.multi_reduction <add>, %91, %cst_28 [1] : vector<8x8xf32> to vector<8xf32>
    %93 = vector.shape_cast %92 : vector<8xf32> to vector<8x1xf32>
    %94 = tpu.reciprocal %93 {approx = true} : vector<8x1xf32> -> vector<8x1xf32>
    %95 = arith.mulf %93, %94 : vector<8x1xf32>
    %cst_29 = arith.constant 2.000000e+00 : f32
    %96 = vector.broadcast %cst_29 : f32 to vector<8x1xf32>
    %97 = arith.subf %96, %95 : vector<8x1xf32>
    %98 = arith.mulf %94, %97 : vector<8x1xf32>
    %99 = vector.broadcast %98 : vector<8x1xf32> to vector<8x8xf32>
    %100 = arith.mulf %91, %99 : vector<8x8xf32>
    %101 = arith.addf %71, %100 : vector<8x8xf32>
    %102 = arith.truncf %100 : vector<8x8xf32> to vector<8x8xbf16>
    %cst_30 = arith.constant dense<0.000000e+00> : vector<8x8xf32>
    %103 = tpu.matmul %102, %83, %cst_30 {dimension_numbers = #tpu.dot_dimension_numbers<[1], [0], [0], [1], [0, 0, 1, 1], [], []>} : vector<8x8xbf16>, vector<8x8xbf16>, vector<8x8xf32> -> vector<8x8xf32>
    %104 = arith.truncf %103 : vector<8x8xf32> to vector<8x8xbf16>
    %c16 = arith.constant 16 : index
    %c0_31 = arith.constant 0 : index
    %105 = vector.load %arg4[%c16, %c0_31] : memref<32x32xbf16, #tpu.memory_space<vmem>>, vector<8x32xbf16>
    %cst_32 = arith.constant dense<0.000000e+00> : vector<8x32xf32>
    %106 = tpu.matmul %104, %105, %cst_32 {dimension_numbers = #tpu.dot_dimension_numbers<[1], [0], [0], [1], [0, 0, 1, 1], [], []>} : vector<8x8xbf16>, vector<8x32xbf16>, vector<8x32xf32> -> vector<8x32xf32>
    %107 = arith.addf %77, %106 : vector<8x32xf32>
    %108 = vector.extract_strided_slice %13 {offsets = [0, 24], sizes = [8, 8], strides = [1, 1]} : vector<8x32xf32> to vector<8x8xf32>
    %109 = arith.truncf %108 : vector<8x8xf32> to vector<8x8xbf16>
    %110 = vector.extract_strided_slice %14 {offsets = [0, 24], sizes = [8, 8], strides = [1, 1]} : vector<8x32xf32> to vector<8x8xf32>
    %111 = arith.truncf %110 : vector<8x8xf32> to vector<8x8xbf16>
    %112 = vector.extract_strided_slice %15 {offsets = [0, 24], sizes = [8, 8], strides = [1, 1]} : vector<8x32xf32> to vector<8x8xf32>
    %113 = arith.truncf %112 : vector<8x8xf32> to vector<8x8xbf16>
    %cst_33 = arith.constant dense<0.000000e+00> : vector<8x8xf32>
    %114 = tpu.matmul %109, %111, %cst_33 {dimension_numbers = #tpu.dot_dimension_numbers<[1], [1], [0], [0], [0, 0, 1, 0], [], []>} : vector<8x8xbf16>, vector<8x8xbf16>, vector<8x8xf32> -> vector<8x8xf32>
    %cst_34 = arith.constant 0.353553385 : f32
    %115 = vector.broadcast %cst_34 : f32 to vector<8x8xf32>
    %116 = arith.mulf %114, %115 : vector<8x8xf32>
    %cst_35 = arith.constant dense<0xFF800000> : vector<8xf32>
    %117 = vector.multi_reduction <maximumf>, %116, %cst_35 [1] : vector<8x8xf32> to vector<8xf32>
    %118 = vector.shape_cast %117 : vector<8xf32> to vector<8x1xf32>
    %119 = vector.broadcast %118 : vector<8x1xf32> to vector<8x8xf32>
    %120 = arith.subf %116, %119 : vector<8x8xf32>
    %121 = math.exp %120 : vector<8x8xf32>
    %cst_36 = arith.constant dense<0.000000e+00> : vector<8xf32>
    %122 = vector.multi_reduction <add>, %121, %cst_36 [1] : vector<8x8xf32> to vector<8xf32>
    %123 = vector.shape_cast %122 : vector<8xf32> to vector<8x1xf32>
    %124 = tpu.reciprocal %123 {approx = true} : vector<8x1xf32> -> vector<8x1xf32>
    %125 = arith.mulf %123, %124 : vector<8x1xf32>
    %cst_37 = arith.constant 2.000000e+00 : f32
    %126 = vector.broadcast %cst_37 : f32 to vector<8x1xf32>
    %127 = arith.subf %126, %125 : vector<8x1xf32>
    %128 = arith.mulf %124, %127 : vector<8x1xf32>
    %129 = vector.broadcast %128 : vector<8x1xf32> to vector<8x8xf32>
    %130 = arith.mulf %121, %129 : vector<8x8xf32>
    %131 = arith.addf %101, %130 : vector<8x8xf32>
    %132 = arith.truncf %130 : vector<8x8xf32> to vector<8x8xbf16>
    %cst_38 = arith.constant dense<0.000000e+00> : vector<8x8xf32>
    %133 = tpu.matmul %132, %113, %cst_38 {dimension_numbers = #tpu.dot_dimension_numbers<[1], [0], [0], [1], [0, 0, 1, 1], [], []>} : vector<8x8xbf16>, vector<8x8xbf16>, vector<8x8xf32> -> vector<8x8xf32>
    %134 = arith.truncf %133 : vector<8x8xf32> to vector<8x8xbf16>
    %c24 = arith.constant 24 : index
    %c0_39 = arith.constant 0 : index
    %135 = vector.load %arg4[%c24, %c0_39] : memref<32x32xbf16, #tpu.memory_space<vmem>>, vector<8x32xbf16>
    %cst_40 = arith.constant dense<0.000000e+00> : vector<8x32xf32>
    %136 = tpu.matmul %134, %135, %cst_40 {dimension_numbers = #tpu.dot_dimension_numbers<[1], [0], [0], [1], [0, 0, 1, 1], [], []>} : vector<8x8xbf16>, vector<8x32xbf16>, vector<8x32xf32> -> vector<8x32xf32>
    %137 = arith.addf %107, %136 : vector<8x32xf32>
    %cst_41 = arith.constant 2.500000e-01 : f32
    %138 = vector.broadcast %cst_41 : f32 to vector<8x8xf32>
    %139 = arith.mulf %131, %138 : vector<8x8xf32>
    %c0_42 = arith.constant 0 : index
    %c0_43 = arith.constant 0 : index
    %c0_44 = arith.constant 0 : index
    %140 = vector.load %arg15[%c0_42, %c0_43, %c0_44] : memref<2x8x8xf32, #tpu.memory_space<vmem>>, vector<1x8x8xf32>
    %141 = vector.shape_cast %140 : vector<1x8x8xf32> to vector<8x8xf32>
    %142 = vector.shape_cast %139 : vector<8x8xf32> to vector<1x8x8xf32>
    tpu.vector_store %arg15[%c0_42, %c0_43, %c0_44], %142 {strides = array<i32>} : memref<2x8x8xf32, #tpu.memory_space<vmem>>, vector<1x8x8xf32>,
    %143 = vector.extract_strided_slice %11 {offsets = [8, 0], sizes = [8, 96], strides = [1, 1]} : vector<16x96xf32> to vector<8x96xf32>
    %144 = vector.extract_strided_slice %143 {offsets = [0, 0], sizes = [8, 32], strides = [1, 1]} : vector<8x96xf32> to vector<8x32xf32>
    %145 = vector.extract_strided_slice %143 {offsets = [0, 32], sizes = [8, 32], strides = [1, 1]} : vector<8x96xf32> to vector<8x32xf32>
    %146 = vector.extract_strided_slice %143 {offsets = [0, 64], sizes = [8, 32], strides = [1, 1]} : vector<8x96xf32> to vector<8x32xf32>
    %cst_45 = arith.constant 0.000000e+00 : f32
    %147 = vector.broadcast %cst_45 : f32 to vector<8x32xf32>
    %cst_46 = arith.constant 0.000000e+00 : f32
    %148 = vector.broadcast %cst_46 : f32 to vector<8x8xf32>
    %149 = vector.extract_strided_slice %144 {offsets = [0, 0], sizes = [8, 8], strides = [1, 1]} : vector<8x32xf32> to vector<8x8xf32>
    %150 = arith.truncf %149 : vector<8x8xf32> to vector<8x8xbf16>
    %151 = vector.extract_strided_slice %145 {offsets = [0, 0], sizes = [8, 8], strides = [1, 1]} : vector<8x32xf32> to vector<8x8xf32>
    %152 = arith.truncf %151 : vector<8x8xf32> to vector<8x8xbf16>
    %153 = vector.extract_strided_slice %146 {offsets = [0, 0], sizes = [8, 8], strides = [1, 1]} : vector<8x32xf32> to vector<8x8xf32>
    %154 = arith.truncf %153 : vector<8x8xf32> to vector<8x8xbf16>
    %cst_47 = arith.constant dense<0.000000e+00> : vector<8x8xf32>
    %155 = tpu.matmul %150, %152, %cst_47 {dimension_numbers = #tpu.dot_dimension_numbers<[1], [1], [0], [0], [0, 0, 1, 0], [], []>} : vector<8x8xbf16>, vector<8x8xbf16>, vector<8x8xf32> -> vector<8x8xf32>
    %cst_48 = arith.constant 0.353553385 : f32
    %156 = vector.broadcast %cst_48 : f32 to vector<8x8xf32>
    %157 = arith.mulf %155, %156 : vector<8x8xf32>
    %cst_49 = arith.constant dense<0xFF800000> : vector<8xf32>
    %158 = vector.multi_reduction <maximumf>, %157, %cst_49 [1] : vector<8x8xf32> to vector<8xf32>
    %159 = vector.shape_cast %158 : vector<8xf32> to vector<8x1xf32>
    %160 = vector.broadcast %159 : vector<8x1xf32> to vector<8x8xf32>
    %161 = arith.subf %157, %160 : vector<8x8xf32>
    %162 = math.exp %161 : vector<8x8xf32>
    %cst_50 = arith.constant dense<0.000000e+00> : vector<8xf32>
    %163 = vector.multi_reduction <add>, %162, %cst_50 [1] : vector<8x8xf32> to vector<8xf32>
    %164 = vector.shape_cast %163 : vector<8xf32> to vector<8x1xf32>
    %165 = tpu.reciprocal %164 {approx = true} : vector<8x1xf32> -> vector<8x1xf32>
    %166 = arith.mulf %164, %165 : vector<8x1xf32>
    %cst_51 = arith.constant 2.000000e+00 : f32
    %167 = vector.broadcast %cst_51 : f32 to vector<8x1xf32>
    %168 = arith.subf %167, %166 : vector<8x1xf32>
    %169 = arith.mulf %165, %168 : vector<8x1xf32>
    %170 = vector.broadcast %169 : vector<8x1xf32> to vector<8x8xf32>
    %171 = arith.mulf %162, %170 : vector<8x8xf32>
    %172 = arith.addf %148, %171 : vector<8x8xf32>
    %173 = arith.truncf %171 : vector<8x8xf32> to vector<8x8xbf16>
    %cst_52 = arith.constant dense<0.000000e+00> : vector<8x8xf32>
    %174 = tpu.matmul %173, %154, %cst_52 {dimension_numbers = #tpu.dot_dimension_numbers<[1], [0], [0], [1], [0, 0, 1, 1], [], []>} : vector<8x8xbf16>, vector<8x8xbf16>, vector<8x8xf32> -> vector<8x8xf32>
    %175 = arith.truncf %174 : vector<8x8xf32> to vector<8x8xbf16>
    %c0_53 = arith.constant 0 : index
    %c0_54 = arith.constant 0 : index
    %176 = vector.load %arg4[%c0_53, %c0_54] : memref<32x32xbf16, #tpu.memory_space<vmem>>, vector<8x32xbf16>
    %cst_55 = arith.constant dense<0.000000e+00> : vector<8x32xf32>
    %177 = tpu.matmul %175, %176, %cst_55 {dimension_numbers = #tpu.dot_dimension_numbers<[1], [0], [0], [1], [0, 0, 1, 1], [], []>} : vector<8x8xbf16>, vector<8x32xbf16>, vector<8x32xf32> -> vector<8x32xf32>
    %178 = arith.addf %147, %177 : vector<8x32xf32>
    %179 = vector.extract_strided_slice %144 {offsets = [0, 8], sizes = [8, 8], strides = [1, 1]} : vector<8x32xf32> to vector<8x8xf32>
    %180 = arith.truncf %179 : vector<8x8xf32> to vector<8x8xbf16>
    %181 = vector.extract_strided_slice %145 {offsets = [0, 8], sizes = [8, 8], strides = [1, 1]} : vector<8x32xf32> to vector<8x8xf32>
    %182 = arith.truncf %181 : vector<8x8xf32> to vector<8x8xbf16>
    %183 = vector.extract_strided_slice %146 {offsets = [0, 8], sizes = [8, 8], strides = [1, 1]} : vector<8x32xf32> to vector<8x8xf32>
    %184 = arith.truncf %183 : vector<8x8xf32> to vector<8x8xbf16>
    %cst_56 = arith.constant dense<0.000000e+00> : vector<8x8xf32>
    %185 = tpu.matmul %180, %182, %cst_56 {dimension_numbers = #tpu.dot_dimension_numbers<[1], [1], [0], [0], [0, 0, 1, 0], [], []>} : vector<8x8xbf16>, vector<8x8xbf16>, vector<8x8xf32> -> vector<8x8xf32>
    %cst_57 = arith.constant 0.353553385 : f32
    %186 = vector.broadcast %cst_57 : f32 to vector<8x8xf32>
    %187 = arith.mulf %185, %186 : vector<8x8xf32>
    %cst_58 = arith.constant dense<0xFF800000> : vector<8xf32>
    %188 = vector.multi_reduction <maximumf>, %187, %cst_58 [1] : vector<8x8xf32> to vector<8xf32>
    %189 = vector.shape_cast %188 : vector<8xf32> to vector<8x1xf32>
    %190 = vector.broadcast %189 : vector<8x1xf32> to vector<8x8xf32>
    %191 = arith.subf %187, %190 : vector<8x8xf32>
    %192 = math.exp %191 : vector<8x8xf32>
    %cst_59 = arith.constant dense<0.000000e+00> : vector<8xf32>
    %193 = vector.multi_reduction <add>, %192, %cst_59 [1] : vector<8x8xf32> to vector<8xf32>
    %194 = vector.shape_cast %193 : vector<8xf32> to vector<8x1xf32>
    %195 = tpu.reciprocal %194 {approx = true} : vector<8x1xf32> -> vector<8x1xf32>
    %196 = arith.mulf %194, %195 : vector<8x1xf32>
    %cst_60 = arith.constant 2.000000e+00 : f32
    %197 = vector.broadcast %cst_60 : f32 to vector<8x1xf32>
    %198 = arith.subf %197, %196 : vector<8x1xf32>
    %199 = arith.mulf %195, %198 : vector<8x1xf32>
    %200 = vector.broadcast %199 : vector<8x1xf32> to vector<8x8xf32>
    %201 = arith.mulf %192, %200 : vector<8x8xf32>
    %202 = arith.addf %172, %201 : vector<8x8xf32>
    %203 = arith.truncf %201 : vector<8x8xf32> to vector<8x8xbf16>
    %cst_61 = arith.constant dense<0.000000e+00> : vector<8x8xf32>
    %204 = tpu.matmul %203, %184, %cst_61 {dimension_numbers = #tpu.dot_dimension_numbers<[1], [0], [0], [1], [0, 0, 1, 1], [], []>} : vector<8x8xbf16>, vector<8x8xbf16>, vector<8x8xf32> -> vector<8x8xf32>
    %205 = arith.truncf %204 : vector<8x8xf32> to vector<8x8xbf16>
    %c8_62 = arith.constant 8 : index
    %c0_63 = arith.constant 0 : index
    %206 = vector.load %arg4[%c8_62, %c0_63] : memref<32x32xbf16, #tpu.memory_space<vmem>>, vector<8x32xbf16>
    %cst_64 = arith.constant dense<0.000000e+00> : vector<8x32xf32>
    %207 = tpu.matmul %205, %206, %cst_64 {dimension_numbers = #tpu.dot_dimension_numbers<[1], [0], [0], [1], [0, 0, 1, 1], [], []>} : vector<8x8xbf16>, vector<8x32xbf16>, vector<8x32xf32> -> vector<8x32xf32>
    %208 = arith.addf %178, %207 : vector<8x32xf32>
    %209 = vector.extract_strided_slice %144 {offsets = [0, 16], sizes = [8, 8], strides = [1, 1]} : vector<8x32xf32> to vector<8x8xf32>
    %210 = arith.truncf %209 : vector<8x8xf32> to vector<8x8xbf16>
    %211 = vector.extract_strided_slice %145 {offsets = [0, 16], sizes = [8, 8], strides = [1, 1]} : vector<8x32xf32> to vector<8x8xf32>
    %212 = arith.truncf %211 : vector<8x8xf32> to vector<8x8xbf16>
    %213 = vector.extract_strided_slice %146 {offsets = [0, 16], sizes = [8, 8], strides = [1, 1]} : vector<8x32xf32> to vector<8x8xf32>
    %214 = arith.truncf %213 : vector<8x8xf32> to vector<8x8xbf16>
    %cst_65 = arith.constant dense<0.000000e+00> : vector<8x8xf32>
    %215 = tpu.matmul %210, %212, %cst_65 {dimension_numbers = #tpu.dot_dimension_numbers<[1], [1], [0], [0], [0, 0, 1, 0], [], []>} : vector<8x8xbf16>, vector<8x8xbf16>, vector<8x8xf32> -> vector<8x8xf32>
    %cst_66 = arith.constant 0.353553385 : f32
    %216 = vector.broadcast %cst_66 : f32 to vector<8x8xf32>
    %217 = arith.mulf %215, %216 : vector<8x8xf32>
    %cst_67 = arith.constant dense<0xFF800000> : vector<8xf32>
    %218 = vector.multi_reduction <maximumf>, %217, %cst_67 [1] : vector<8x8xf32> to vector<8xf32>
    %219 = vector.shape_cast %218 : vector<8xf32> to vector<8x1xf32>
    %220 = vector.broadcast %219 : vector<8x1xf32> to vector<8x8xf32>
    %221 = arith.subf %217, %220 : vector<8x8xf32>
    %222 = math.exp %221 : vector<8x8xf32>
    %cst_68 = arith.constant dense<0.000000e+00> : vector<8xf32>
    %223 = vector.multi_reduction <add>, %222, %cst_68 [1] : vector<8x8xf32> to vector<8xf32>
    %224 = vector.shape_cast %223 : vector<8xf32> to vector<8x1xf32>
    %225 = tpu.reciprocal %224 {approx = true} : vector<8x1xf32> -> vector<8x1xf32>
    %226 = arith.mulf %224, %225 : vector<8x1xf32>
    %cst_69 = arith.constant 2.000000e+00 : f32
    %227 = vector.broadcast %cst_69 : f32 to vector<8x1xf32>
    %228 = arith.subf %227, %226 : vector<8x1xf32>
    %229 = arith.mulf %225, %228 : vector<8x1xf32>
    %230 = vector.broadcast %229 : vector<8x1xf32> to vector<8x8xf32>
    %231 = arith.mulf %222, %230 : vector<8x8xf32>
    %232 = arith.addf %202, %231 : vector<8x8xf32>
    %233 = arith.truncf %231 : vector<8x8xf32> to vector<8x8xbf16>
    %cst_70 = arith.constant dense<0.000000e+00> : vector<8x8xf32>
    %234 = tpu.matmul %233, %214, %cst_70 {dimension_numbers = #tpu.dot_dimension_numbers<[1], [0], [0], [1], [0, 0, 1, 1], [], []>} : vector<8x8xbf16>, vector<8x8xbf16>, vector<8x8xf32> -> vector<8x8xf32>
    %235 = arith.truncf %234 : vector<8x8xf32> to vector<8x8xbf16>
    %c16_71 = arith.constant 16 : index
    %c0_72 = arith.constant 0 : index
    %236 = vector.load %arg4[%c16_71, %c0_72] : memref<32x32xbf16, #tpu.memory_space<vmem>>, vector<8x32xbf16>
    %cst_73 = arith.constant dense<0.000000e+00> : vector<8x32xf32>
    %237 = tpu.matmul %235, %236, %cst_73 {dimension_numbers = #tpu.dot_dimension_numbers<[1], [0], [0], [1], [0, 0, 1, 1], [], []>} : vector<8x8xbf16>, vector<8x32xbf16>, vector<8x32xf32> -> vector<8x32xf32>
    %238 = arith.addf %208, %237 : vector<8x32xf32>
    %239 = vector.extract_strided_slice %144 {offsets = [0, 24], sizes = [8, 8], strides = [1, 1]} : vector<8x32xf32> to vector<8x8xf32>
    %240 = arith.truncf %239 : vector<8x8xf32> to vector<8x8xbf16>
    %241 = vector.extract_strided_slice %145 {offsets = [0, 24], sizes = [8, 8], strides = [1, 1]} : vector<8x32xf32> to vector<8x8xf32>
    %242 = arith.truncf %241 : vector<8x8xf32> to vector<8x8xbf16>
    %243 = vector.extract_strided_slice %146 {offsets = [0, 24], sizes = [8, 8], strides = [1, 1]} : vector<8x32xf32> to vector<8x8xf32>
    %244 = arith.truncf %243 : vector<8x8xf32> to vector<8x8xbf16>
    %cst_74 = arith.constant dense<0.000000e+00> : vector<8x8xf32>
    %245 = tpu.matmul %240, %242, %cst_74 {dimension_numbers = #tpu.dot_dimension_numbers<[1], [1], [0], [0], [0, 0, 1, 0], [], []>} : vector<8x8xbf16>, vector<8x8xbf16>, vector<8x8xf32> -> vector<8x8xf32>
    %cst_75 = arith.constant 0.353553385 : f32
    %246 = vector.broadcast %cst_75 : f32 to vector<8x8xf32>
    %247 = arith.mulf %245, %246 : vector<8x8xf32>
    %cst_76 = arith.constant dense<0xFF800000> : vector<8xf32>
    %248 = vector.multi_reduction <maximumf>, %247, %cst_76 [1] : vector<8x8xf32> to vector<8xf32>
    %249 = vector.shape_cast %248 : vector<8xf32> to vector<8x1xf32>
    %250 = vector.broadcast %249 : vector<8x1xf32> to vector<8x8xf32>
    %251 = arith.subf %247, %250 : vector<8x8xf32>
    %252 = math.exp %251 : vector<8x8xf32>
    %cst_77 = arith.constant dense<0.000000e+00> : vector<8xf32>
    %253 = vector.multi_reduction <add>, %252, %cst_77 [1] : vector<8x8xf32> to vector<8xf32>
    %254 = vector.shape_cast %253 : vector<8xf32> to vector<8x1xf32>
    %255 = tpu.reciprocal %254 {approx = true} : vector<8x1xf32> -> vector<8x1xf32>
    %256 = arith.mulf %254, %255 : vector<8x1xf32>
    %cst_78 = arith.constant 2.000000e+00 : f32
    %257 = vector.broadcast %cst_78 : f32 to vector<8x1xf32>
    %258 = arith.subf %257, %256 : vector<8x1xf32>
    %259 = arith.mulf %255, %258 : vector<8x1xf32>
    %260 = vector.broadcast %259 : vector<8x1xf32> to vector<8x8xf32>
    %261 = arith.mulf %252, %260 : vector<8x8xf32>
    %262 = arith.addf %232, %261 : vector<8x8xf32>
    %263 = arith.truncf %261 : vector<8x8xf32> to vector<8x8xbf16>
    %cst_79 = arith.constant dense<0.000000e+00> : vector<8x8xf32>
    %264 = tpu.matmul %263, %244, %cst_79 {dimension_numbers = #tpu.dot_dimension_numbers<[1], [0], [0], [1], [0, 0, 1, 1], [], []>} : vector<8x8xbf16>, vector<8x8xbf16>, vector<8x8xf32> -> vector<8x8xf32>
    %265 = arith.truncf %264 : vector<8x8xf32> to vector<8x8xbf16>
    %c24_80 = arith.constant 24 : index
    %c0_81 = arith.constant 0 : index
    %266 = vector.load %arg4[%c24_80, %c0_81] : memref<32x32xbf16, #tpu.memory_space<vmem>>, vector<8x32xbf16>
    %cst_82 = arith.constant dense<0.000000e+00> : vector<8x32xf32>
    %267 = tpu.matmul %265, %266, %cst_82 {dimension_numbers = #tpu.dot_dimension_numbers<[1], [0], [0], [1], [0, 0, 1, 1], [], []>} : vector<8x8xbf16>, vector<8x32xbf16>, vector<8x32xf32> -> vector<8x32xf32>
    %268 = arith.addf %238, %267 : vector<8x32xf32>
    %cst_83 = arith.constant 2.500000e-01 : f32
    %269 = vector.broadcast %cst_83 : f32 to vector<8x8xf32>
    %270 = arith.mulf %262, %269 : vector<8x8xf32>
    %c1 = arith.constant 1 : index
    %c0_84 = arith.constant 0 : index
    %c0_85 = arith.constant 0 : index
    %271 = vector.load %arg15[%c1, %c0_84, %c0_85] : memref<2x8x8xf32, #tpu.memory_space<vmem>>, vector<1x8x8xf32>
    %272 = vector.shape_cast %271 : vector<1x8x8xf32> to vector<8x8xf32>
    %273 = vector.shape_cast %270 : vector<8x8xf32> to vector<1x8x8xf32>
    tpu.vector_store %arg15[%c1, %c0_84, %c0_85], %273 {strides = array<i32>} : memref<2x8x8xf32, #tpu.memory_space<vmem>>, vector<1x8x8xf32>,
    %274 = tpu.concatenate %137, %268 in 0 : vector<8x32xf32>, vector<8x32xf32> -> vector<16x32xf32>
    %c0_86 = arith.constant 0 : index
    %c0_87 = arith.constant 0 : index
    %275 = vector.load %arg5[%c0_86, %c0_87] : memref<1x32xf32, #tpu.memory_space<vmem>>, vector<1x32xf32>
    %276 = vector.broadcast %275 : vector<1x32xf32> to vector<16x32xf32>
    %277 = arith.addf %274, %276 : vector<16x32xf32>
    %278 = arith.addf %5, %277 : vector<16x32xf32>
    %c0_88 = arith.constant 0 : index
    %c0_89 = arith.constant 0 : index
    %279 = vector.load %arg6[%c0_88, %c0_89] : memref<1x32xf32, #tpu.memory_space<vmem>>, vector<1x32xf32>
    %c0_90 = arith.constant 0 : index
    %c0_91 = arith.constant 0 : index
    %280 = vector.load %arg7[%c0_90, %c0_91] : memref<1x32xf32, #tpu.memory_space<vmem>>, vector<1x32xf32>
    %cst_92 = arith.constant dense<0.000000e+00> : vector<16xf32>
    %281 = vector.multi_reduction <add>, %278, %cst_92 [1] : vector<16x32xf32> to vector<16xf32>
    %282 = vector.shape_cast %281 : vector<16xf32> to vector<16x1xf32>
    %cst_93 = arith.constant 3.200000e+01 : f32
    %283 = vector.broadcast %cst_93 : f32 to vector<16x1xf32>
    %284 = arith.divf %282, %283 : vector<16x1xf32>
    %285 = vector.broadcast %284 : vector<16x1xf32> to vector<16x32xf32>
    %286 = arith.subf %278, %285 : vector<16x32xf32>
    %287 = arith.mulf %286, %286 : vector<16x32xf32>
    %cst_94 = arith.constant dense<0.000000e+00> : vector<16xf32>
    %288 = vector.multi_reduction <add>, %287, %cst_94 [1] : vector<16x32xf32> to vector<16xf32>
    %289 = vector.shape_cast %288 : vector<16xf32> to vector<16x1xf32>
    %cst_95 = arith.constant 3.200000e+01 : f32
    %290 = vector.broadcast %cst_95 : f32 to vector<16x1xf32>
    %291 = arith.divf %289, %290 : vector<16x1xf32>
    %cst_96 = arith.constant 9.99999974E-6 : f32
    %292 = vector.broadcast %cst_96 : f32 to vector<16x1xf32>
    %293 = arith.addf %291, %292 : vector<16x1xf32>
    %294 = math.rsqrt %293 : vector<16x1xf32>
    %295 = vector.broadcast %294 : vector<16x1xf32> to vector<16x32xf32>
    %296 = arith.mulf %286, %295 : vector<16x32xf32>
    %297 = vector.broadcast %279 : vector<1x32xf32> to vector<16x32xf32>
    %298 = arith.mulf %296, %297 : vector<16x32xf32>
    %299 = vector.broadcast %280 : vector<1x32xf32> to vector<16x32xf32>
    %300 = arith.addf %298, %299 : vector<16x32xf32>
    %301 = arith.truncf %300 : vector<16x32xf32> to vector<16x32xbf16>
    %c0_97 = arith.constant 0 : index
    %c0_98 = arith.constant 0 : index
    %302 = vector.load %arg8[%c0_97, %c0_98] : memref<32x64xbf16, #tpu.memory_space<vmem>>, vector<32x64xbf16>
    %cst_99 = arith.constant dense<0.000000e+00> : vector<16x64xf32>
    %303 = tpu.matmul %301, %302, %cst_99 {dimension_numbers = #tpu.dot_dimension_numbers<[1], [0], [0], [1], [0, 0, 1, 1], [], []>} : vector<16x32xbf16>, vector<32x64xbf16>, vector<16x64xf32> -> vector<16x64xf32>
    %c0_100 = arith.constant 0 : index
    %c0_101 = arith.constant 0 : index
    %304 = vector.load %arg9[%c0_100, %c0_101] : memref<1x64xf32, #tpu.memory_space<vmem>>, vector<1x64xf32>
    %305 = vector.broadcast %304 : vector<1x64xf32> to vector<16x64xf32>
    %306 = arith.addf %303, %305 : vector<16x64xf32>
    %cst_102 = arith.constant 0.000000e+00 : f32
    %307 = vector.broadcast %cst_102 : f32 to vector<16x64xf32>
    %308 = arith.maximumf %306, %307 : vector<16x64xf32>
    %309 = arith.truncf %308 : vector<16x64xf32> to vector<16x64xbf16>
    %c0_103 = arith.constant 0 : index
    %c0_104 = arith.constant 0 : index
    %310 = vector.load %arg10[%c0_103, %c0_104] : memref<64x32xbf16, #tpu.memory_space<vmem>>, vector<64x32xbf16>
    %cst_105 = arith.constant dense<0.000000e+00> : vector<16x32xf32>
    %311 = tpu.matmul %309, %310, %cst_105 {dimension_numbers = #tpu.dot_dimension_numbers<[1], [0], [0], [1], [0, 0, 1, 1], [], []>} : vector<16x64xbf16>, vector<64x32xbf16>, vector<16x32xf32> -> vector<16x32xf32>
    %c0_106 = arith.constant 0 : index
    %c0_107 = arith.constant 0 : index
    %312 = vector.load %arg11[%c0_106, %c0_107] : memref<1x32xf32, #tpu.memory_space<vmem>>, vector<1x32xf32>
    %313 = vector.broadcast %312 : vector<1x32xf32> to vector<16x32xf32>
    %314 = arith.addf %311, %313 : vector<16x32xf32>
    %315 = arith.addf %300, %314 : vector<16x32xf32>
    %c0_108 = arith.constant 0 : index
    %c0_109 = arith.constant 0 : index
    %316 = vector.load %arg12[%c0_108, %c0_109] : memref<1x32xf32, #tpu.memory_space<vmem>>, vector<1x32xf32>
    %c0_110 = arith.constant 0 : index
    %c0_111 = arith.constant 0 : index
    %317 = vector.load %arg13[%c0_110, %c0_111] : memref<1x32xf32, #tpu.memory_space<vmem>>, vector<1x32xf32>
    %cst_112 = arith.constant dense<0.000000e+00> : vector<16xf32>
    %318 = vector.multi_reduction <add>, %315, %cst_112 [1] : vector<16x32xf32> to vector<16xf32>
    %319 = vector.shape_cast %318 : vector<16xf32> to vector<16x1xf32>
    %cst_113 = arith.constant 3.200000e+01 : f32
    %320 = vector.broadcast %cst_113 : f32 to vector<16x1xf32>
    %321 = arith.divf %319, %320 : vector<16x1xf32>
    %322 = vector.broadcast %321 : vector<16x1xf32> to vector<16x32xf32>
    %323 = arith.subf %315, %322 : vector<16x32xf32>
    %324 = arith.mulf %323, %323 : vector<16x32xf32>
    %cst_114 = arith.constant dense<0.000000e+00> : vector<16xf32>
    %325 = vector.multi_reduction <add>, %324, %cst_114 [1] : vector<16x32xf32> to vector<16xf32>
    %326 = vector.shape_cast %325 : vector<16xf32> to vector<16x1xf32>
    %cst_115 = arith.constant 3.200000e+01 : f32
    %327 = vector.broadcast %cst_115 : f32 to vector<16x1xf32>
    %328 = arith.divf %326, %327 : vector<16x1xf32>
    %cst_116 = arith.constant 9.99999974E-6 : f32
    %329 = vector.broadcast %cst_116 : f32 to vector<16x1xf32>
    %330 = arith.addf %328, %329 : vector<16x1xf32>
    %331 = math.rsqrt %330 : vector<16x1xf32>
    %332 = vector.broadcast %331 : vector<16x1xf32> to vector<16x32xf32>
    %333 = arith.mulf %323, %332 : vector<16x32xf32>
    %334 = vector.broadcast %316 : vector<1x32xf32> to vector<16x32xf32>
    %335 = arith.mulf %333, %334 : vector<16x32xf32>
    %336 = vector.broadcast %317 : vector<1x32xf32> to vector<16x32xf32>
    %337 = arith.addf %335, %336 : vector<16x32xf32>
    %338 = vector.extract_strided_slice %337 {offsets = [0, 0], sizes = [8, 32], strides = [1, 1]} : vector<16x32xf32> to vector<8x32xf32>
    %339 = vector.extract_strided_slice %337 {offsets = [8, 0], sizes = [8, 32], strides = [1, 1]} : vector<16x32xf32> to vector<8x32xf32>
    %340 = vector.shape_cast %338 : vector<8x32xf32> to vector<8x1x32xf32>
    %341 = vector.shape_cast %339 : vector<8x32xf32> to vector<8x1x32xf32>
    %342 = tpu.concatenate %340, %341 in 1 : vector<8x1x32xf32>, vector<8x1x32xf32> -> vector<8x2x32xf32>
    %c0_117 = arith.constant 0 : index
    %c0_118 = arith.constant 0 : index
    %c0_119 = arith.constant 0 : index
    %343 = vector.load %arg14[%c0_117, %c0_118, %c0_119] : memref<8x2x32xf32, #tpu.memory_space<vmem>>, vector<8x2x32xf32>
    tpu.vector_store %arg14[%c0_117, %c0_118, %c0_119], %342 {strides = array<i32>} : memref<8x2x32xf32, #tpu.memory_space<vmem>>, vector<8x2x32xf32>,
    return
  }
  func.func @transform_0(%arg0: i32) -> (i32, i32, i32) {
    %c0_i32 = arith.constant 0 : i32
    %c0_i32_0 = arith.constant 0 : i32
    %c0_i32_1 = arith.constant 0 : i32
    return %c0_i32, %arg0, %c0_i32_0 : i32, i32, i32
  }
  func.func @transform_1(%arg0: i32) -> (i32, i32) {
    %c0_i32 = arith.constant 0 : i32
    %c0_i32_0 = arith.constant 0 : i32
    %c0_i32_1 = arith.constant 0 : i32
    return %c0_i32, %c0_i32_0 : i32, i32
  }
  func.func @transform_2(%arg0: i32) -> (i32, i32) {
    %c0_i32 = arith.constant 0 : i32
    %c0_i32_0 = arith.constant 0 : i32
    %c0_i32_1 = arith.constant 0 : i32
    return %c0_i32, %c0_i32_0 : i32, i32
  }
  func.func @transform_3(%arg0: i32) -> (i32, i32) {
    %c0_i32 = arith.constant 0 : i32
    %c0_i32_0 = arith.constant 0 : i32
    %c0_i32_1 = arith.constant 0 : i32
    return %c0_i32, %c0_i32_0 : i32, i32
  }
  func.func @transform_4(%arg0: i32) -> (i32, i32) {
    %c0_i32 = arith.constant 0 : i32
    %c0_i32_0 = arith.constant 0 : i32
    %c0_i32_1 = arith.constant 0 : i32
    return %c0_i32, %c0_i32_0 : i32, i32
  }
  func.func @transform_5(%arg0: i32) -> (i32, i32) {
    %c0_i32 = arith.constant 0 : i32
    %c0_i32_0 = arith.constant 0 : i32
    %c0_i32_1 = arith.constant 0 : i32
    return %c0_i32, %c0_i32_0 : i32, i32
  }
  func.func @transform_6(%arg0: i32) -> (i32, i32) {
    %c0_i32 = arith.constant 0 : i32
    %c0_i32_0 = arith.constant 0 : i32
    %c0_i32_1 = arith.constant 0 : i32
    return %c0_i32, %c0_i32_0 : i32, i32
  }
  func.func @transform_7(%arg0: i32) -> (i32, i32) {
    %c0_i32 = arith.constant 0 : i32
    %c0_i32_0 = arith.constant 0 : i32
    %c0_i32_1 = arith.constant 0 : i32
    return %c0_i32, %c0_i32_0 : i32, i32
  }
  func.func @transform_8(%arg0: i32) -> (i32, i32) {
    %c0_i32 = arith.constant 0 : i32
    %c0_i32_0 = arith.constant 0 : i32
    %c0_i32_1 = arith.constant 0 : i32
    return %c0_i32, %c0_i32_0 : i32, i32
  }
  func.func @transform_9(%arg0: i32) -> (i32, i32) {
    %c0_i32 = arith.constant 0 : i32
    %c0_i32_0 = arith.constant 0 : i32
    %c0_i32_1 = arith.constant 0 : i32
    return %c0_i32, %c0_i32_0 : i32, i32
  }
  func.func @transform_10(%arg0: i32) -> (i32, i32) {
    %c0_i32 = arith.constant 0 : i32
    %c0_i32_0 = arith.constant 0 : i32
    %c0_i32_1 = arith.constant 0 : i32
    return %c0_i32, %c0_i32_0 : i32, i32
  }
  func.func @transform_11(%arg0: i32) -> (i32, i32) {
    %c0_i32 = arith.constant 0 : i32
    %c0_i32_0 = arith.constant 0 : i32
    %c0_i32_1 = arith.constant 0 : i32
    return %c0_i32, %c0_i32_0 : i32, i32
  }
  func.func @transform_12(%arg0: i32) -> (i32, i32) {
    %c0_i32 = arith.constant 0 : i32
    %c0_i32_0 = arith.constant 0 : i32
    %c0_i32_1 = arith.constant 0 : i32
    return %c0_i32, %c0_i32_0 : i32, i32
  }
  func.func @transform_13(%arg0: i32) -> (i32, i32, i32) {
    %c0_i32 = arith.constant 0 : i32
    %c0_i32_0 = arith.constant 0 : i32
    %c0_i32_1 = arith.constant 0 : i32
    return %c0_i32, %arg0, %c0_i32_0 : i32, i32, i32
  }
  func.func @transform_14(%arg0: i32) -> (i32, i32, i32) {
    %c0_i32 = arith.constant 0 : i32
    %c0_i32_0 = arith.constant 0 : i32
    %c0_i32_1 = arith.constant 0 : i32
    return %arg0, %c0_i32, %c0_i32_0 : i32, i32, i32
  }
}

</mosaic_0001>

<bundles_post_ra>
// kernel: tpu_custom_call.1
= control target key start
LH: loop header
LB: loop body
LE: loop exit
PB: predicated region body
PF: predicated region fallthrough
CT: control target
= control target key end

     0   :  { %20 = vsyncpa [#allocation3], 0  ;;  %s2869_s0 = inlined_call_operand.vmem [shape: f32[8,2,32], index: 0, kind: input, shape index: {}]   ;;  %s2870_s1 = inlined_call_operand.vmem [shape: bf16[32,96], index: 1, kind: input, shape index: {}]   ;;  %s2871_s2 = inlined_call_operand.vmem [shape: f32[1,96], index: 2, kind: input, shape index: {}]   ;;  %s2872_s3 = inlined_call_operand.vmem [shape: bf16[32,32], index: 3, kind: input, shape index: {}]   ;;  %s2873_s4 = inlined_call_operand.vmem [shape: f32[1,32], index: 4, kind: input, shape index: {}]   ;;  %s2874_s5 = inlined_call_operand.vmem [shape: f32[1,32], index: 5, kind: input, shape index: {}]   ;;  %s2875_s6 = inlined_call_operand.vmem [shape: f32[1,32], index: 6, kind: input, shape index: {}]   ;;  %s2876_s7 = inlined_call_operand.hbm [shape: bf16[32,64], index: 7, kind: input, shape index: {}]   ;;  %s2877_s8 = inlined_call_operand.vmem [shape: f32[1,64], index: 8, kind: input, shape index: {}]   ;;  %s2878_s9 = inlined_call_operand.vmem [shape: bf16[64,32], index: 9, kind: input, shape index: {}]   ;;  %s2879_s10 = inlined_call_operand.vmem [shape: f32[1,32], index: 10, kind: input, shape index: {}]   ;;  %s2880_s11 = inlined_call_operand.vmem [shape: f32[1,32], index: 11, kind: input, shape index: {}]   ;;  %s2881_s12 = inlined_call_operand.vmem [shape: f32[1,32], index: 12, kind: input, shape index: {}]   ;;  %s2882_s13 = inlined_call_operand.hbm [shape: f32[8,2,32], index: 13, kind: output, shape index: {0}]   ;;  %s2883_s14 = inlined_call_operand.hbm [shape: f32[2,8,8], index: 14, kind: output, shape index: {1}]  }
   0x1   :  { %21 = vsyncpa [#allocation4], 0 }
   0x2   :  { %22 = vsyncpa [#allocation7], 0  ;;  %s2372_s29 = smov [#allocation2]   ;;  %s2300_s17 = scalar_lea.hbm %s2876_s7, 256 }
   0x3   :  { %s42_s30 = sshll.u32 %s2372_s29, 4  ;;  %p2301_p0 = scmp.ne.s32.totalorder %s2876_s7, %s2300_s17  ;;  %s43_s30 = int_to_ptr.vmem [resolvable:$true] %s42_s30 }
   0x4   :  { %p2304_p1 = scmp.lt.u32.totalorder %s2300_s17, %s2876_s7 }
   0x6   :  { %p2306_p2 = pnand %p2304_p1, %p2301_p0 }
   0x8   :  { %2309 = shalt.err (!%p2306_p2)
}
   0x9   :  { %s2310_s22 = scalar_lea.vmem %s43_s30, 256  ;;  %p2315_p4 = scmp.lt.s32.totalorder %s43_s30, %s43_s30 }
   0xa   :  { %p2311_p3 = scmp.ne.s32.totalorder %s43_s30, %s2310_s22  ;;  %p2316_p5 = scmp.lt.s32.totalorder %s2310_s22, %s2310_s22 }
   0xc   :  { %p2317_p6 = por %p2316_p5, %p2315_p4 }
   0xe   :  { %p2318_p7 = pnand %p2317_p6, %p2311_p3 }
  0x10   :  { %2321 = shalt.err (!%p2318_p7)
}
  0x11   :  { %s2373_s23 = smov 64   ;;  %s2374_s24 = smov 4  }
  0x12   :  { %48 = dma.hbm_to_vmem [thread:$0]  %s2876_s7, 256, %s43_s30, [#allocation3], %s2373_s23, %s2373_s23, %s2374_s24  }
  0x13   :  { %2366 = dma.done.wait [#allocation3], 256  }
  0x14   :  { %2367 = vsyncadd [#allocation3], 4294967040  ;;  %v2375_v0 = vmov 0.0   ;;  %vm2376_vm0 = vmmov 0   ;;  %vm80_vm1 = vcmask 1041409   ;;  %vm83_vm2 = vcmask 1042434  }
  0x15   :  { %2058 = vmatprep.subr.bf16.mxu1 %v2375_v0  ;;  %2062 = vmatprep.mubr.msk.bf16.mxu1 %vm2376_vm0, %v2375_v0  ;;  %vm86_vm3 = vcmask 1043459   ;;  %vm89_vm4 = vcmask 1044484   ;;  %vm92_vm5 = vcmask 1045509   ;;  %v2252_v1 = vld [vmem:[%s2870_s1] sm:$0xff]   ;;  %vm95_vm6 = vcmask 1046534   ;;  %v2253_v2 = vld [vmem:[%s2870_s1 + $0x8] sm:$0xff]  }
  0x16   :  { %2072 = vmatprep.subr.bf16.mxu0 %v2375_v0  ;;  %2074 = vmatprep.mubr.msk.bf16.mxu0 %vm2376_vm0, %v2375_v0  ;;  %vm98_vm7 = vcmask 1047559   ;;  %v63_v3 = vld [vmem:[%s2869_s0] sm:$0x3]  ;;  %v64_v4 = vld [vmem:[%s2869_s0 + $0x2] sm:$0x3]  ;;  %vm140_vm8 = vcmask 261120  }
  0x17   :  { %2059 = vmatpush3.bf16.msra.mxu1 %v2252_v1  ;;  %v65_v5 = vld [vmem:[%s2869_s0 + $0x4] sm:$0x3]  ;;  %v66_v6 = vld [vmem:[%s2869_s0 + $0x6] sm:$0x3]  ;;  %v67_v7 = vld [vmem:[%s2869_s0 + $0x8] sm:$0x3] }
  0x18   :  { %2060 = vmatprep.subr.bf16.mxu1 %v2375_v0  ;;  %v68_v8 = vld [vmem:[%s2869_s0 + $0xa] sm:$0x3]  ;;  %v69_v9 = vld [vmem:[%s2869_s0 + $0xc] sm:$0x3]  ;;  %v70_v10 = vld [vmem:[%s2869_s0 + $0xe] sm:$0x3] }
  0x19   :  { %v79_v11 = vrot.slane %v64_v4, 7  ;;  %v82_v12 = vrot.slane %v65_v5, 6  ;;  %v85_v13 = vrot.slane %v66_v6, 5  ;;  %v88_v14 = vrot.slane %v67_v7, 4  ;;  %v1956_v40 = vld [vmem:[%s2871_s2] ss:$0 sm:$0xff] }
  0x1a   :  { %v91_v15 = vrot.slane %v68_v8, 3  ;;  %v94_v16 = vrot.slane %v69_v9, 2  ;;  %v97_v18 = vrot.slane %v70_v10, 1  ;;  %v101_v19 = vrot.slane %v63_v3, 1  ;;  %s2377_s30 = smov 120   ;;  %s2378_s15 = smov 96  }
  0x1b   :  { %2061 = vmatpush3.bf16.msra.mxu1 %v2253_v2  ;;  %v81_v17 = vsel %vm80_vm1, %v79_v11, %v63_v3  ;;  %v103_v20 = vrot.slane %v65_v5, 7  ;;  %v105_v22 = vrot.slane %v66_v6, 6  ;;  %v107_v23 = vrot.slane %v67_v7, 5  ;;  %s2379_s16 = smov 88   ;;  %s2380_s2 = smov 56  }
  0x1c   :  { %v84_v21 = vsel %vm83_vm2, %v82_v12, %v81_v17  ;;  %v109_v24 = vrot.slane %v68_v8, 4  ;;  %2066 = vmatprep.subr.bf16.mxu1 %v2375_v0  ;;  %v102_v26 = vsel %vm80_vm1, %v64_v4, %v101_v19  ;;  %v111_v27 = vrot.slane %v69_v9, 3  ;;  %s2381_s17 = smov 112   ;;  %s2382_s18 = smov 80  }
  0x1d   :  { %v87_v25 = vsel %vm86_vm3, %v85_v13, %v84_v21  ;;  %v113_v28 = vrot.slane %v70_v10, 2  ;;  %v104_v30 = vsel %vm83_vm2, %v103_v20, %v102_v26  ;;  %vm189_vm9 = vcmask 64512   ;;  %s2383_s22 = smov 72   ;;  %s2384_s24 = smov 104  }
  0x1e   :  { %v90_v29 = vsel %vm89_vm4, %v88_v14, %v87_v25  ;;  %v106_v32 = vsel %vm86_vm3, %v105_v22, %v104_v30  ;;  %vm258_vm10 = vcmask 1043456   ;;  %s2385_s25 = smov 48   ;;  %s2386_s27 = smov 40   ;;  %vm1666_vm11 = vcmask 523264  }
  0x1f   :  { %v93_v31 = vsel %vm92_vm5, %v91_v15, %v90_v29  ;;  %v108_v34 = vsel %vm89_vm4, %v107_v23, %v106_v32 }
  0x20   :  { %v96_v33 = vsel %vm95_vm6, %v94_v16, %v93_v31  ;;  %v110_v36 = vsel %vm92_vm5, %v109_v24, %v108_v34  ;;  %v303_v31 = vld [vmem:[%s2872_s3] sm:$0xf] }
  0x21   :  { %v2532_v35 = vsel %vm98_vm7, %v97_v18, %v96_v33  ;;  %v112_v37 = vsel %vm95_vm6, %v111_v27, %v110_v36  ;;  %v471_v32 = vsel %vm258_vm10, %v303_v31, 0  ;;  %v420_v33 = vld [vmem:[%s2872_s3 + $0x4] sm:$0xf] }
  0x22   :  { %v2537_v38 = vsel %vm98_vm7, %v113_v28, %v112_v37  ;;  %v425_v34 = vsel %vm258_vm10, %v420_v33, 0 }
  0x23   :  { %v116_v39 = vpack.c.bf16 %v2537_v38, %v2532_v35 }
  0x25   :  { %2063 = vmatmul.mubr.msk.bf16.vlgmr.msra.gmra.mrb[0].mxu1 %vm140_vm8, %v116_v39 }
  0x26   :  { %2068 = vmatprep.mubr.msk.bf16.mxu1 %vm2376_vm0, %v2375_v0 }
  0xf8   :  { %v178_v41 = vpop.f32.mrb[0].mxu1 }
  0xf9   :  { %v179_v42 = vadd.f32 %v1956_v40, %v178_v41  ;;  %v2064_v43 = vpop.f32.mrb[1].mxu1 }
  0xfa   :  { %v181_v44 = vpop.f32.mrb[2].mxu1 }
  0xfb   :  { %v2547_v45 = vpack.c.bf16 %v179_v42, %v179_v42  ;;  %v2549_v46 = vadd.f32 %v1956_v40, %v181_v44  ;;  %v2065_v47 = vpop.f32.mrb[3].mxu1 }
  0xfd   :  { %304 = vrot.lane.b32.xlu1 %v2547_v45, %s2377_s30  ;;  %187 = vrot.lane.b32.xlu0 %v2547_v45, %s2378_s15 }
 0x101   :  { %306 = vrot.lane.b32.xlu0 %v2547_v45, %s2379_s16 }
 0x16f   :  { %v188_v48 = vpop.permute.xlu0 %187  ;;  %v305_v52 = vpop.permute.xlu1 %304 }
 0x170   :  { %v194_v49 = vsel %vm189_vm9, %v188_v48, 0 }
 0x171   :  { %2067 = vmatpush3.bf16.xpose.msra.mxu1 %v194_v49 }
 0x172   :  { %2078 = vmatprep.subr.bf16.mxu1 %v2375_v0 }
 0x173   :  { %v307_v50 = vpop.permute.xlu0 %306 }
 0x174   :  { %v312_v51 = vsel %vm189_vm9, %v307_v50, 0 }
 0x178   :  { %2069 = vmatmul.mubr.msk.bf16.vlgmr.msra.gmra.mrb[4].mxu1 %vm189_vm9, %v2547_v45 }
 0x179   :  { %2079 = vmatpush3.bf16.xpose.msra.mxu1 %v312_v51  ;;  %2080 = vmatprep.mubr.msk.bf16.mxu1 %vm2376_vm0, %v2375_v0 }
 0x17a   :  { %2090 = vmatprep.subr.bf16.mxu1 %v2375_v0 }
 0x180   :  { %2081 = vmatmul.mubr.msk.bf16.vlgmr.msra.gmra.mrb[8].mxu1 %vm189_vm9, %v305_v52 }
 0x181   :  { %2092 = vmatprep.mubr.msk.bf16.mxu1 %vm2376_vm0, %v2375_v0  ;;  %2091 = vmatpush3.bf16.msra.mxu1 %v425_v34 }
 0x182   :  { %2102 = vmatprep.subr.bf16.mxu1 %v2375_v0 }
 0x24b   :  { %v230_v53 = vpop.f32.mrb[4].mxu1 }
 0x24c   :  { %v236_v54 = vmul.f32 0.35355338, %v230_v53  ;;  %v2070_v55 = vpop.f32.mrb[5].mxu1 }
 0x24d   :  { %v233_v56 = vpop.f32.mrb[6].mxu1 }
 0x24e   :  { %v2071_v57 = vpop.f32.mrb[7].mxu1  ;;  %v237_v58 = vsel %vm189_vm9, %v236_v54, -inf }
 0x24f   :  { %238 = vmax.xlane.f32.xlu1 %v237_v58 }
 0x253   :  { %v348_v59 = vpop.f32.mrb[8].mxu1 }
 0x254   :  { %v354_v60 = vmul.f32 0.35355338, %v348_v59  ;;  %v2082_v61 = vpop.f32.mrb[9].mxu1 }
 0x255   :  { %v351_v62 = vpop.f32.mrb[10].mxu1 }
 0x256   :  { %v2083_v63 = vpop.f32.mrb[11].mxu1  ;;  %v355_v1 = vsel %vm189_vm9, %v354_v60, -inf }
 0x257   :  { %356 = vmax.xlane.f32.xlu0 %v355_v1 }
 0x2dc   :  { %v239_v2 = vpop.xlane.xlu1 %238 }
 0x2dd   :  { %v240_v3 = vsub.f32 %v236_v54, %v239_v2 }
 0x2df   :  { %v241_v4 = vmul.f32 1.442695, %v240_v3 }
 0x2e1   :  { %2260 = vpow2.f32 %v241_v4 }
 0x2e4   :  { %v357_v5 = vpop.xlane.xlu0 %356 }
 0x2e5   :  { %v358_v6 = vsub.f32 %v354_v60, %v357_v5 }
 0x2e7   :  { %v359_v7 = vmul.f32 1.442695, %v358_v6 }
 0x2e9   :  { %2262 = vpow2.f32 %v359_v7 }
 0x2eb   :  { %v2261_v8 = vpop.eup %2260 }
 0x2ec   :  { %v243_v9 = vsel %vm189_vm9, %v2261_v8, 0.0 }
 0x2ed   :  { %244 = vadd.xlane.f32.xlu0 %v243_v9 }
 0x2f3   :  { %v2263_v10 = vpop.eup %2262 }
 0x2f4   :  { %v361_v11 = vsel %vm189_vm9, %v2263_v10, 0.0 }
 0x2f5   :  { %362 = vadd.xlane.f32.xlu1 %v361_v11 }
 0x303   :  { %253 = vrot.lane.b32.xlu0 %v2547_v45, %s2373_s23 }
 0x306   :  { %371 = vrot.lane.b32.xlu1 %v2547_v45, %s2380_s2 }
 0x307   :  { %513 = vrot.lane.b32.xlu0 %v2547_v45, %s2381_s17 }
 0x30a   :  { %515 = vrot.lane.b32.xlu1 %v2547_v45, %s2382_s18 }
 0x37a   :  { %v245_v12 = vpop.xlane.xlu0 %244 }
 0x37b   :  { %2264 = vrcp.f32 %v245_v12 }
 0x37e   :  { %v254_v13 = vpop.permute.xlu0 %253 }
 0x37f   :  { %v260_v14 = vsel %vm258_vm10, %v254_v13, 0 }
 0x380   :  { %2073 = vmatpush3.bf16.msra.mxu0 %v260_v14 }
 0x381   :  { %2084 = vmatprep.subr.bf16.mxu0 %v2375_v0 }
 0x382   :  { %v363_v15 = vpop.xlane.xlu1 %362  ;;  %v514_v51 = vpop.permute.xlu0 %513 }
 0x383   :  { %2266 = vrcp.f32 %v363_v15 }
 0x385   :  { %v2265_v16 = vpop.eup %2264 }
 0x386   :  { %v247_v17 = vmul.f32 %v2265_v16, %v245_v12  ;;  %v372_v22 = vpop.permute.xlu1 %371 }
 0x387   :  { %v377_v26 = vsel %vm258_vm10, %v372_v22, 0  ;;  %v629_v22 = vld [vmem:[%s2872_s3 + $0x8] sm:$0xf] }
 0x388   :  { %v248_v18 = vsub.f32 2.0, %v247_v17 }
 0x38a   :  { %v249_v19 = vmul.f32 %v2265_v16, %v248_v18  ;;  %v516_v42 = vpop.permute.xlu1 %515 }
 0x38b   :  { %v521_v49 = vsel %vm189_vm9, %v516_v42, 0 }
 0x38c   :  { %v250_v20 = vmul.f32 %v2261_v8, %v249_v19 }
 0x38d   :  { %v2267_v21 = vpop.eup %2266 }
 0x38e   :  { %v365_v23 = vmul.f32 %v2267_v21, %v363_v15  ;;  %v252_v24 = vpack.c.bf16 %v250_v20, %v250_v20 }
 0x390   :  { %v366_v25 = vsub.f32 2.0, %v365_v23  ;;  %2075 = vmatmul.mubr.msk.bf16.vlgmr.msra.gmra.mrb[0].mxu0 %vm189_vm9, %v252_v24  ;;  %v634_v23 = vsel %vm258_vm10, %v629_v22, 0 }
 0x391   :  { %2085 = vmatpush3.bf16.msra.mxu0 %v377_v26  ;;  %2086 = vmatprep.mubr.msk.bf16.mxu0 %vm2376_vm0, %v2375_v0 }
 0x392   :  { %v367_v27 = vmul.f32 %v2267_v21, %v366_v25  ;;  %2096 = vmatprep.subr.bf16.mxu0 %v2375_v0 }
 0x394   :  { %v368_v28 = vmul.f32 %v2263_v10, %v367_v27 }
 0x396   :  { %v2587_v29 = vadd.f32 %v368_v28, %v250_v20  ;;  %v370_v30 = vpack.c.bf16 %v368_v28, %v368_v28 }
 0x398   :  { %2087 = vmatmul.mubr.msk.bf16.vlgmr.msra.gmra.mrb[4].mxu0 %vm189_vm9, %v370_v30 }
 0x399   :  { %2098 = vmatprep.mubr.msk.bf16.mxu0 %vm2376_vm0, %v2375_v0  ;;  %2097 = vmatpush3.bf16.msra.mxu0 %v471_v32 }
 0x39a   :  { %2108 = vmatprep.subr.bf16.mxu0 %v2375_v0 }
 0x463   :  { %v296_v36 = vpop.f32.mrb[0].mxu0 }
 0x464   :  { %v302_v37 = vpack.c.bf16 %v296_v36, %v296_v36  ;;  %v2076_v39 = vpop.f32.mrb[1].mxu0  ;;  %v2647_v36 = vpack.c.bf16 %v2549_v46, %v2549_v46 }
 0x465   :  { %v299_v40 = vpop.f32.mrb[2].mxu0 }
 0x466   :  { %v2077_v41 = vpop.f32.mrb[3].mxu0  ;;  %2099 = vmatmul.mubr.msk.bf16.vlgmr.msra.gmra.mrb[8].mxu0 %vm189_vm9, %v302_v37 }
 0x467   :  { %2110 = vmatprep.mubr.msk.bf16.mxu0 %vm2376_vm0, %v2375_v0 }
 0x46b   :  { %v413_v43 = vpop.f32.mrb[4].mxu0 }
 0x46c   :  { %v419_v44 = vpack.c.bf16 %v413_v43, %v413_v43  ;;  %v2088_v47 = vpop.f32.mrb[5].mxu0 }
 0x46d   :  { %v416_v48 = vpop.f32.mrb[6].mxu0 }
 0x46e   :  { %v2089_v50 = vpop.f32.mrb[7].mxu0  ;;  %2093 = vmatmul.mubr.msk.bf16.vlgmr.msra.gmra.mrb[12].mxu1 %vm189_vm9, %v419_v44 }
 0x46f   :  { %2103 = vmatpush3.bf16.xpose.msra.mxu1 %v521_v49  ;;  %2104 = vmatprep.mubr.msk.bf16.mxu1 %vm2376_vm0, %v2375_v0 }
 0x470   :  { %2114 = vmatprep.subr.bf16.mxu1 %v2375_v0 }
 0x476   :  { %2105 = vmatmul.mubr.msk.bf16.vlgmr.msra.gmra.mrb[16].mxu1 %vm189_vm9, %v514_v51 }
 0x477   :  { %2116 = vmatprep.mubr.msk.bf16.mxu1 %vm2376_vm0, %v2375_v0  ;;  %2115 = vmatpush3.bf16.msra.mxu1 %v634_v23 }
 0x478   :  { %2126 = vmatprep.subr.bf16.mxu1 %v2375_v0 }
 0x539   :  { %v507_v52 = vpop.f32.mrb[8].mxu0 }
 0x53a   :  { %v2100_v53 = vpop.f32.mrb[9].mxu0 }
 0x53b   :  { %v510_v54 = vpop.f32.mrb[10].mxu0 }
 0x53c   :  { %v2101_v55 = vpop.f32.mrb[11].mxu0 }
 0x541   :  { %v461_v56 = vpop.f32.mrb[12].mxu1 }
 0x542   :  { %v2613_v57 = vadd.f32 %v507_v52, %v461_v56  ;;  %v2094_v58 = vpop.f32.mrb[13].mxu1 }
 0x543   :  { %v464_v59 = vpop.f32.mrb[14].mxu1 }
 0x544   :  { %v2095_v60 = vpop.f32.mrb[15].mxu1 }
 0x549   :  { %v557_v61 = vpop.f32.mrb[16].mxu1 }
 0x54a   :  { %v563_v62 = vmul.f32 0.35355338, %v557_v61  ;;  %v2106_v63 = vpop.f32.mrb[17].mxu1 }
 0x54b   :  { %v560_v1 = vpop.f32.mrb[18].mxu1 }
 0x54c   :  { %v2107_v2 = vpop.f32.mrb[19].mxu1  ;;  %v564_v3 = vsel %vm189_vm9, %v563_v62, -inf  ;;  %v793_v1 = vld [vmem:[%s2872_s3 + $0xc] sm:$0xf] }
 0x54d   :  { %565 = vmax.xlane.f32.xlu1 %v564_v3  ;;  %v798_v2 = vsel %vm258_vm10, %v793_v1, 0 }
 0x55e   :  { %679 = vrot.lane.b32.xlu1 %v2547_v45, %s2383_s22 }
 0x562   :  { %677 = vrot.lane.b32.xlu1 %v2547_v45, %s2384_s24 }
 0x5da   :  { %v566_v4 = vpop.xlane.xlu1 %565 }
 0x5db   :  { %v567_v5 = vsub.f32 %v563_v62, %v566_v4 }
 0x5dd   :  { %v568_v6 = vmul.f32 1.442695, %v567_v5 }
 0x5de   :  { %v680_v17 = vpop.permute.xlu1 %679 }
 0x5df   :  { %2268 = vpow2.f32 %v568_v6  ;;  %v685_v20 = vsel %vm189_vm9, %v680_v17, 0 }
 0x5e2   :  { %v678_v21 = vpop.permute.xlu1 %677 }
 0x5e9   :  { %v2269_v7 = vpop.eup %2268 }
 0x5ea   :  { %v570_v8 = vsel %vm189_vm9, %v2269_v7, 0.0 }
 0x5eb   :  { %571 = vadd.xlane.f32.xlu0 %v570_v8 }
 0x601   :  { %580 = vrot.lane.b32.xlu0 %v2547_v45, %s2385_s25 }
 0x678   :  { %v572_v9 = vpop.xlane.xlu0 %571 }
 0x679   :  { %2270 = vrcp.f32 %v572_v9 }
 0x67c   :  { %v581_v10 = vpop.permute.xlu0 %580 }
 0x67d   :  { %v586_v11 = vsel %vm258_vm10, %v581_v10, 0 }
 0x67e   :  { %2109 = vmatpush3.bf16.msra.mxu0 %v586_v11 }
 0x67f   :  { %2120 = vmatprep.subr.bf16.mxu0 %v2375_v0 }
 0x683   :  { %v2271_v12 = vpop.eup %2270 }
 0x684   :  { %v574_v13 = vmul.f32 %v2271_v12, %v572_v9 }
 0x686   :  { %v575_v14 = vsub.f32 2.0, %v574_v13 }
 0x688   :  { %v576_v15 = vmul.f32 %v2271_v12, %v575_v14 }
 0x68a   :  { %v577_v16 = vmul.f32 %v2269_v7, %v576_v15 }
 0x68c   :  { %v578_v18 = vadd.f32 %v577_v16, %v2587_v29  ;;  %v579_v19 = vpack.c.bf16 %v577_v16, %v577_v16 }
 0x68e   :  { %2111 = vmatmul.mubr.msk.bf16.vlgmr.msra.gmra.mrb[12].mxu0 %vm189_vm9, %v579_v19 }
 0x68f   :  { %2121 = vmatpush3.bf16.xpose.msra.mxu0 %v685_v20  ;;  %2122 = vmatprep.mubr.msk.bf16.mxu0 %vm2376_vm0, %v2375_v0 }
 0x690   :  { %2132 = vmatprep.subr.bf16.mxu0 %v2375_v0 }
 0x696   :  { %2123 = vmatmul.mubr.msk.bf16.vlgmr.msra.gmra.mrb[16].mxu0 %vm189_vm9, %v678_v21 }
 0x697   :  { %2134 = vmatprep.mubr.msk.bf16.mxu0 %vm2376_vm0, %v2375_v0  ;;  %2133 = vmatpush3.bf16.msra.mxu0 %v798_v2 }
 0x698   :  { %2144 = vmatprep.subr.bf16.mxu0 %v2375_v0 }
 0x761   :  { %v622_v24 = vpop.f32.mrb[12].mxu0 }
 0x762   :  { %v628_v25 = vpack.c.bf16 %v622_v24, %v622_v24  ;;  %v2112_v26 = vpop.f32.mrb[13].mxu0 }
 0x763   :  { %v625_v27 = vpop.f32.mrb[14].mxu0 }
 0x764   :  { %v2113_v28 = vpop.f32.mrb[15].mxu0  ;;  %2117 = vmatmul.mubr.msk.bf16.vlgmr.msra.gmra.mrb[20].mxu1 %vm189_vm9, %v628_v25 }
 0x765   :  { %2128 = vmatprep.mubr.msk.bf16.mxu1 %vm2376_vm0, %v2375_v0 }
 0x769   :  { %v721_v29 = vpop.f32.mrb[16].mxu0 }
 0x76a   :  { %v727_v30 = vmul.f32 0.35355338, %v721_v29  ;;  %v2124_v31 = vpop.f32.mrb[17].mxu0 }
 0x76b   :  { %v724_v32 = vpop.f32.mrb[18].mxu0 }
 0x76c   :  { %v2125_v33 = vpop.f32.mrb[19].mxu0  ;;  %v728_v34 = vsel %vm189_vm9, %v727_v30, -inf }
 0x76d   :  { %729 = vmax.xlane.f32.xlu0 %v728_v34 }
 0x783   :  { %744 = vrot.lane.b32.xlu0 %v2547_v45, %s2386_s27 }
 0x787   :  { %962 = vrot.lane.b32.xlu0 %v2647_v36, %s2379_s16 }
 0x7fa   :  { %v730_v37 = vpop.xlane.xlu0 %729 }
 0x7fb   :  { %v731_v39 = vsub.f32 %v727_v30, %v730_v37 }
 0x7fd   :  { %v732_v40 = vmul.f32 1.442695, %v731_v39 }
 0x7fe   :  { %v745_v41 = vpop.permute.xlu0 %744 }
 0x7ff   :  { %2272 = vpow2.f32 %v732_v40  ;;  %v750_v42 = vsel %vm258_vm10, %v745_v41, 0 }
 0x800   :  { %2127 = vmatpush3.bf16.msra.mxu1 %v750_v42 }
 0x801   :  { %2138 = vmatprep.subr.bf16.mxu1 %v2375_v0 }
 0x809   :  { %v2273_v43 = vpop.eup %2272 }
 0x80a   :  { %v734_v45 = vsel %vm189_vm9, %v2273_v43, 0.0 }
 0x80b   :  { %735 = vadd.xlane.f32.xlu1 %v734_v45 }
 0x81c   :  { %845 = vrot.lane.b32.xlu1 %v2647_v36, %s2378_s15 }
 0x820   :  { %960 = vrot.lane.b32.xlu1 %v2647_v36, %s2377_s30 }
 0x837   :  { %v670_v46 = vpop.f32.mrb[20].mxu1 }
 0x838   :  { %v2659_v44 = vadd.f32 %v670_v46, %v2613_v57  ;;  %v2118_v47 = vpop.f32.mrb[21].mxu1  ;;  %v963_v57 = vpop.permute.xlu0 %962 }
 0x839   :  { %v673_v48 = vpop.f32.mrb[22].mxu1  ;;  %v968_v62 = vsel %vm189_vm9, %v963_v57, 0 }
 0x83a   :  { %v2119_v49 = vpop.f32.mrb[23].mxu1 }
 0x898   :  { %v736_v50 = vpop.xlane.xlu1 %735 }
 0x899   :  { %2274 = vrcp.f32 %v736_v50 }
 0x89c   :  { %v846_v56 = vpop.permute.xlu1 %845 }
 0x89d   :  { %v851_v61 = vsel %vm189_vm9, %v846_v56, 0 }
 0x8a0   :  { %v961_v63 = vpop.permute.xlu1 %960 }
 0x8a3   :  { %v2275_v51 = vpop.eup %2274 }
 0x8a4   :  { %v738_v52 = vmul.f32 %v2275_v51, %v736_v50 }
 0x8a6   :  { %v739_v53 = vsub.f32 2.0, %v738_v52 }
 0x8a8   :  { %v740_v54 = vmul.f32 %v2275_v51, %v739_v53 }
 0x8aa   :  { %v741_v55 = vmul.f32 %v2273_v43, %v740_v54 }
 0x8ac   :  { %v742_v58 = vadd.f32 %v741_v55, %v578_v18  ;;  %v743_v59 = vpack.c.bf16 %v741_v55, %v741_v55 }
 0x8ae   :  { %v841_v60 = vmul.f32 0.25, %v742_v58  ;;  %2129 = vmatmul.mubr.msk.bf16.vlgmr.msra.gmra.mrb[24].mxu1 %vm189_vm9, %v743_v59  ;;  %v959_v58 = vld [vmem:[%s2872_s3] sm:$0xf] }
 0x8af   :  { %2139 = vmatpush3.bf16.xpose.msra.mxu1 %v851_v61  ;;  %2140 = vmatprep.mubr.msk.bf16.mxu1 %vm2376_vm0, %v2375_v0  ;;  %v1127_v59 = vsel %vm258_vm10, %v959_v58, 0 }
 0x8b0   :  { %842 = vst.msk [vmem:[#allocation6] sm:$0xff] %vm189_vm9, %v841_v60  ;;  %2150 = vmatprep.subr.bf16.mxu1 %v2375_v0  ;;  %v1076_v60 = vld [vmem:[%s2872_s3 + $0x4] sm:$0xf] }
 0x8b1   :  { %v1081_v61 = vsel %vm258_vm10, %v1076_v60, 0 }
 0x8b6   :  { %2141 = vmatmul.mubr.msk.bf16.vlgmr.msra.gmra.mrb[28].mxu1 %vm189_vm9, %v2647_v36 }
 0x8b7   :  { %2151 = vmatpush3.bf16.xpose.msra.mxu1 %v968_v62  ;;  %2152 = vmatprep.mubr.msk.bf16.mxu1 %vm2376_vm0, %v2375_v0 }
 0x8b8   :  { %2162 = vmatprep.subr.bf16.mxu1 %v2375_v0 }
 0x8be   :  { %2153 = vmatmul.mubr.msk.bf16.vlgmr.msra.gmra.mrb[32].mxu1 %vm189_vm9, %v961_v63 }
 0x8bf   :  { %2164 = vmatprep.mubr.msk.bf16.mxu1 %vm2376_vm0, %v2375_v0  ;;  %2163 = vmatpush3.bf16.msra.mxu1 %v1081_v61 }
 0x8c0   :  { %2174 = vmatprep.subr.bf16.mxu1 %v2375_v0 }
 0x981   :  { %v786_v3 = vpop.f32.mrb[24].mxu1 }
 0x982   :  { %v792_v4 = vpack.c.bf16 %v786_v3, %v786_v3  ;;  %v2130_v5 = vpop.f32.mrb[25].mxu1 }
 0x983   :  { %v789_v6 = vpop.f32.mrb[26].mxu1 }
 0x984   :  { %v2131_v7 = vpop.f32.mrb[27].mxu1  ;;  %2135 = vmatmul.mubr.msk.bf16.vlgmr.msra.gmra.mrb[20].mxu0 %vm189_vm9, %v792_v4 }
 0x985   :  { %2146 = vmatprep.mubr.msk.bf16.mxu0 %vm2376_vm0, %v2375_v0 }
 0x989   :  { %v887_v8 = vpop.f32.mrb[28].mxu1 }
 0x98a   :  { %v893_v9 = vmul.f32 0.35355338, %v887_v8  ;;  %v2142_v10 = vpop.f32.mrb[29].mxu1 }
 0x98b   :  { %v890_v11 = vpop.f32.mrb[30].mxu1 }
 0x98c   :  { %v2143_v12 = vpop.f32.mrb[31].mxu1  ;;  %v894_v13 = vsel %vm189_vm9, %v893_v9, -inf }
 0x98d   :  { %895 = vmax.xlane.f32.xlu0 %v894_v13 }
 0x991   :  { %v1004_v14 = vpop.f32.mrb[32].mxu1 }
 0x992   :  { %v1010_v15 = vmul.f32 0.35355338, %v1004_v14  ;;  %v2154_v16 = vpop.f32.mrb[33].mxu1 }
 0x993   :  { %v1007_v17 = vpop.f32.mrb[34].mxu1 }
 0x994   :  { %v2155_v18 = vpop.f32.mrb[35].mxu1  ;;  %v1011_v19 = vsel %vm189_vm9, %v1010_v15, -inf }
 0x995   :  { %1012 = vmax.xlane.f32.xlu1 %v1011_v19 }
 0x9a6   :  { %910 = vrot.lane.b32.xlu1 %v2647_v36, %s2373_s23 }
 0x9aa   :  { %1171 = vrot.lane.b32.xlu1 %v2647_v36, %s2382_s18 }
 0x9ae   :  { %1169 = vrot.lane.b32.xlu1 %v2647_v36, %s2381_s17 }
 0xa1a   :  { %v896_v20 = vpop.xlane.xlu0 %895 }
 0xa1b   :  { %v897_v21 = vsub.f32 %v893_v9, %v896_v20 }
 0xa1d   :  { %v898_v22 = vmul.f32 1.442695, %v897_v21 }
 0xa1f   :  { %2276 = vpow2.f32 %v898_v22 }
 0xa22   :  { %v1013_v23 = vpop.xlane.xlu1 %1012 }
 0xa23   :  { %v1014_v24 = vsub.f32 %v1010_v15, %v1013_v23 }
 0xa25   :  { %v1015_v25 = vmul.f32 1.442695, %v1014_v24 }
 0xa26   :  { %v911_v26 = vpop.permute.xlu1 %910 }
 0xa27   :  { %2278 = vpow2.f32 %v1015_v25  ;;  %v916_v27 = vsel %vm258_vm10, %v911_v26, 0 }
 0xa28   :  { %2145 = vmatpush3.bf16.msra.mxu0 %v916_v27 }
 0xa29   :  { %v2277_v28 = vpop.eup %2276  ;;  %2156 = vmatprep.subr.bf16.mxu0 %v2375_v0 }
 0xa2a   :  { %v900_v29 = vsel %vm189_vm9, %v2277_v28, 0.0  ;;  %v1172_v3 = vpop.permute.xlu1 %1171 }
 0xa2b   :  { %901 = vadd.xlane.f32.xlu0 %v900_v29  ;;  %v1177_v8 = vsel %vm189_vm9, %v1172_v3, 0 }
 0xa2e   :  { %v1170_v10 = vpop.permute.xlu1 %1169 }
 0xa31   :  { %v2279_v30 = vpop.eup %2278 }
 0xa32   :  { %v1017_v31 = vsel %vm189_vm9, %v2279_v30, 0.0 }
 0xa33   :  { %1018 = vadd.xlane.f32.xlu0 %v1017_v31 }
 0xa49   :  { %1027 = vrot.lane.b32.xlu0 %v2647_v36, %s2380_s2 }
 0xa57   :  { %v834_v32 = vpop.f32.mrb[20].mxu0 }
 0xa58   :  { %v2699_v33 = vadd.f32 %v834_v32, %v2659_v44  ;;  %v2136_v34 = vpop.f32.mrb[21].mxu0 }
 0xa59   :  { %v837_v37 = vpop.f32.mrb[22].mxu0 }
 0xa5a   :  { %v2137_v39 = vpop.f32.mrb[23].mxu0 }
 0xab8   :  { %v902_v40 = vpop.xlane.xlu0 %901 }
 0xab9   :  { %2280 = vrcp.f32 %v902_v40 }
 0xac0   :  { %v1019_v41 = vpop.xlane.xlu0 %1018 }
 0xac1   :  { %2282 = vrcp.f32 %v1019_v41 }
 0xac3   :  { %v2281_v42 = vpop.eup %2280 }
 0xac4   :  { %v904_v43 = vmul.f32 %v2281_v42, %v902_v40  ;;  %v1028_v49 = vpop.permute.xlu0 %1027 }
 0xac5   :  { %v1033_v44 = vsel %vm258_vm10, %v1028_v49, 0  ;;  %v1285_v49 = vld [vmem:[%s2872_s3 + $0x8] sm:$0xf] }
 0xac6   :  { %v905_v45 = vsub.f32 2.0, %v904_v43 }
 0xac8   :  { %v906_v46 = vmul.f32 %v2281_v42, %v905_v45 }
 0xaca   :  { %v907_v47 = vmul.f32 %v2277_v28, %v906_v46 }
 0xacb   :  { %v2283_v48 = vpop.eup %2282 }
 0xacc   :  { %v909_v50 = vpack.c.bf16 %v907_v47, %v907_v47  ;;  %v1021_v51 = vmul.f32 %v2283_v48, %v1019_v41 }
 0xace   :  { %v1022_v52 = vsub.f32 2.0, %v1021_v51  ;;  %2147 = vmatmul.mubr.msk.bf16.vlgmr.msra.gmra.mrb[24].mxu0 %vm189_vm9, %v909_v50  ;;  %v1290_v50 = vsel %vm258_vm10, %v1285_v49, 0 }
 0xacf   :  { %2157 = vmatpush3.bf16.msra.mxu0 %v1033_v44  ;;  %2158 = vmatprep.mubr.msk.bf16.mxu0 %vm2376_vm0, %v2375_v0 }
 0xad0   :  { %v1023_v53 = vmul.f32 %v2283_v48, %v1022_v52  ;;  %2168 = vmatprep.subr.bf16.mxu0 %v2375_v0 }
 0xad2   :  { %v1024_v54 = vmul.f32 %v2279_v30, %v1023_v53 }
 0xad4   :  { %v2706_v55 = vadd.f32 %v1024_v54, %v907_v47  ;;  %v1026_v56 = vpack.c.bf16 %v1024_v54, %v1024_v54 }
 0xad6   :  { %2159 = vmatmul.mubr.msk.bf16.vlgmr.msra.gmra.mrb[28].mxu0 %vm189_vm9, %v1026_v56 }
 0xad7   :  { %2170 = vmatprep.mubr.msk.bf16.mxu0 %vm2376_vm0, %v2375_v0  ;;  %2169 = vmatpush3.bf16.msra.mxu0 %v1127_v59 }
 0xad8   :  { %2180 = vmatprep.subr.bf16.mxu0 %v2375_v0 }
 0xba1   :  { %v952_v57 = vpop.f32.mrb[24].mxu0 }
 0xba2   :  { %v958_v62 = vpack.c.bf16 %v952_v57, %v952_v57  ;;  %v2148_v63 = vpop.f32.mrb[25].mxu0 }
 0xba3   :  { %v955_v1 = vpop.f32.mrb[26].mxu0 }
 0xba4   :  { %v2149_v2 = vpop.f32.mrb[27].mxu0  ;;  %2171 = vmatmul.mubr.msk.bf16.vlgmr.msra.gmra.mrb[32].mxu0 %vm189_vm9, %v958_v62 }
 0xba5   :  { %2182 = vmatprep.mubr.msk.bf16.mxu0 %vm2376_vm0, %v2375_v0 }
 0xba9   :  { %v1069_v4 = vpop.f32.mrb[28].mxu0 }
 0xbaa   :  { %v1075_v5 = vpack.c.bf16 %v1069_v4, %v1069_v4  ;;  %v2160_v6 = vpop.f32.mrb[29].mxu0 }
 0xbab   :  { %v1072_v7 = vpop.f32.mrb[30].mxu0  ;;  %v1449_v6 = vld [vmem:[%s2872_s3 + $0xc] sm:$0xf] }
 0xbac   :  { %v2161_v9 = vpop.f32.mrb[31].mxu0  ;;  %2165 = vmatmul.mubr.msk.bf16.vlgmr.msra.gmra.mrb[36].mxu1 %vm189_vm9, %v1075_v5 }
 0xbad   :  { %2175 = vmatpush3.bf16.xpose.msra.mxu1 %v1177_v8  ;;  %2176 = vmatprep.mubr.msk.bf16.mxu1 %vm2376_vm0, %v2375_v0 }
 0xbae   :  { %2186 = vmatprep.subr.bf16.mxu1 %v2375_v0 }
 0xbb4   :  { %2177 = vmatmul.mubr.msk.bf16.vlgmr.msra.gmra.mrb[40].mxu1 %vm189_vm9, %v1170_v10 }
 0xbb5   :  { %2188 = vmatprep.mubr.msk.bf16.mxu1 %vm2376_vm0, %v2375_v0  ;;  %2187 = vmatpush3.bf16.msra.mxu1 %v1290_v50  ;;  %v2254_v50 = vld [vmem:[#allocation2] sm:$0xff]  }
 0xbb6   :  { %2198 = vmatprep.subr.bf16.mxu1 %v2375_v0 }
 0xc77   :  { %v1163_v11 = vpop.f32.mrb[32].mxu0 }
 0xc78   :  { %v2172_v12 = vpop.f32.mrb[33].mxu0 }
 0xc79   :  { %v1166_v13 = vpop.f32.mrb[34].mxu0 }
 0xc7a   :  { %v2173_v14 = vpop.f32.mrb[35].mxu0 }
 0xc7f   :  { %v1117_v15 = vpop.f32.mrb[36].mxu1 }
 0xc80   :  { %v2732_v16 = vadd.f32 %v1163_v11, %v1117_v15  ;;  %v2166_v17 = vpop.f32.mrb[37].mxu1 }
 0xc81   :  { %v1120_v18 = vpop.f32.mrb[38].mxu1 }
 0xc82   :  { %v2167_v19 = vpop.f32.mrb[39].mxu1 }
 0xc87   :  { %v1213_v20 = vpop.f32.mrb[40].mxu1 }
 0xc88   :  { %v1219_v21 = vmul.f32 0.35355338, %v1213_v20  ;;  %v2178_v22 = vpop.f32.mrb[41].mxu1 }
 0xc89   :  { %v1216_v23 = vpop.f32.mrb[42].mxu1 }
 0xc8a   :  { %v2179_v24 = vpop.f32.mrb[43].mxu1  ;;  %v1220_v25 = vsel %vm189_vm9, %v1219_v21, -inf }
 0xc8b   :  { %1221 = vmax.xlane.f32.xlu0 %v1220_v25 }
 0xca1   :  { %1236 = vrot.lane.b32.xlu0 %v2647_v36, %s2385_s25 }
 0xca5   :  { %1333 = vrot.lane.b32.xlu0 %v2647_v36, %s2384_s24 }
 0xd18   :  { %v1222_v26 = vpop.xlane.xlu0 %1221 }
 0xd19   :  { %v1223_v27 = vsub.f32 %v1219_v21, %v1222_v26 }
 0xd1b   :  { %v1224_v28 = vmul.f32 1.442695, %v1223_v27 }
 0xd1c   :  { %v1237_v29 = vpop.permute.xlu0 %1236 }
 0xd1d   :  { %2284 = vpow2.f32 %v1224_v28  ;;  %v1242_v30 = vsel %vm258_vm10, %v1237_v29, 0 }
 0xd1e   :  { %2181 = vmatpush3.bf16.msra.mxu0 %v1242_v30 }
 0xd1f   :  { %2192 = vmatprep.subr.bf16.mxu0 %v2375_v0 }
 0xd20   :  { %v1334_v48 = vpop.permute.xlu0 %1333 }
 0xd27   :  { %v2285_v31 = vpop.eup %2284 }
 0xd28   :  { %v1226_v32 = vsel %vm189_vm9, %v2285_v31, 0.0 }
 0xd29   :  { %1227 = vadd.xlane.f32.xlu1 %v1226_v32 }
 0xd3a   :  { %1335 = vrot.lane.b32.xlu1 %v2647_v36, %s2383_s22 }
 0xdb6   :  { %v1228_v34 = vpop.xlane.xlu1 %1227 }
 0xdb7   :  { %2286 = vrcp.f32 %v1228_v34 }
 0xdba   :  { %v1336_v43 = vpop.permute.xlu1 %1335 }
 0xdbb   :  { %v1341_v47 = vsel %vm189_vm9, %v1336_v43, 0 }
 0xdc1   :  { %v2287_v37 = vpop.eup %2286 }
 0xdc2   :  { %v1230_v39 = vmul.f32 %v2287_v37, %v1228_v34 }
 0xdc4   :  { %v1231_v40 = vsub.f32 2.0, %v1230_v39 }
 0xdc6   :  { %v1232_v41 = vmul.f32 %v2287_v37, %v1231_v40 }
 0xdc8   :  { %v1233_v42 = vmul.f32 %v2285_v31, %v1232_v41 }
 0xdca   :  { %v1234_v45 = vadd.f32 %v1233_v42, %v2706_v55  ;;  %v1235_v46 = vpack.c.bf16 %v1233_v42, %v1233_v42  ;;  %v1984_v55 = vld [vmem:[%s2873_s4] ss:$0 sm:$0xff] }
 0xdcb   :  { %v1507_v56 = vadd.f32 %v1984_v55, %v2699_v33 }
 0xdcc   :  { %2183 = vmatmul.mubr.msk.bf16.vlgmr.msra.gmra.mrb[36].mxu0 %vm189_vm9, %v1235_v46 }
 0xdcd   :  { %2193 = vmatpush3.bf16.xpose.msra.mxu0 %v1341_v47  ;;  %2194 = vmatprep.mubr.msk.bf16.mxu0 %vm2376_vm0, %v2375_v0  ;;  %v1509_v63 = vadd.f32 %v1507_v56, %v2532_v35  ;;  %v1454_v35 = vsel %vm258_vm10, %v1449_v6, 0  ;;  %v2259_v6 = vld [vmem:[%s2878_s9 + $0x18] sm:$0xff]  }
 0xdce   :  { %2204 = vmatprep.subr.bf16.mxu0 %v2375_v0 }
 0xdcf   :  { %v1513_v1 = vsel %vm140_vm8, %v1509_v63, 0.0 }
 0xdd4   :  { %2195 = vmatmul.mubr.msk.bf16.vlgmr.msra.gmra.mrb[40].mxu0 %vm189_vm9, %v1334_v48 }
 0xdd5   :  { %2206 = vmatprep.mubr.msk.bf16.mxu0 %vm2376_vm0, %v2375_v0  ;;  %2205 = vmatpush3.bf16.msra.mxu0 %v1454_v35  ;;  %v1987_v35 = vld [vmem:[%s2877_s8] ss:$0 sm:$0xff]  ;;  %s2387_s8 = smov [#allocation6]  }
 0xdd6   :  { %2218 = vmatprep.subr.bf16.mxu0 %v2375_v0 }
 0xe9f   :  { %v1278_v51 = vpop.f32.mrb[36].mxu0 }
 0xea0   :  { %v1284_v52 = vpack.c.bf16 %v1278_v51, %v1278_v51  ;;  %v2184_v44 = vpop.f32.mrb[37].mxu0  ;;  %v2255_v51 = vld [vmem:[#allocation2 + $0x8] sm:$0xff]  }
 0xea1   :  { %v1281_v53 = vpop.f32.mrb[38].mxu0 }
 0xea2   :  { %v2185_v54 = vpop.f32.mrb[39].mxu0  ;;  %2189 = vmatmul.mubr.msk.bf16.vlgmr.msra.gmra.mrb[44].mxu1 %vm189_vm9, %v1284_v52  ;;  %v2257_v52 = vld [vmem:[%s2878_s9 + $0x8] sm:$0xff]  }
 0xea3   :  { %2200 = vmatprep.mubr.msk.bf16.mxu1 %vm2376_vm0, %v2375_v0 }
 0xea7   :  { %v1377_v58 = vpop.f32.mrb[40].mxu0 }
 0xea8   :  { %v1383_v59 = vmul.f32 0.35355338, %v1377_v58  ;;  %v2196_v60 = vpop.f32.mrb[41].mxu0 }
 0xea9   :  { %v1380_v61 = vpop.f32.mrb[42].mxu0 }
 0xeaa   :  { %v2197_v57 = vpop.f32.mrb[43].mxu0  ;;  %v1384_v62 = vsel %vm189_vm9, %v1383_v59, -inf  ;;  %v1985_v61 = vld [vmem:[%s2874_s5] ss:$0 sm:$0xff] }
 0xeab   :  { %1385 = vmax.xlane.f32.xlu1 %v1384_v62 }
 0xeaf   :  { %1514 = vadd.xlane.f32.xlu1 %v1513_v1  ;;  %v1986_v1 = vld [vmem:[%s2875_s6] ss:$0 sm:$0xff] }
 0xf38   :  { %v1386_v2 = vpop.xlane.xlu1 %1385 }
 0xf39   :  { %v1387_v3 = vsub.f32 %v1383_v59, %v1386_v2 }
 0xf3b   :  { %v1388_v4 = vmul.f32 1.442695, %v1387_v3 }
 0xf3c   :  { %v1515_v27 = vpop.xlane.xlu1 %1514 }
 0xf3d   :  { %2288 = vpow2.f32 %v1388_v4  ;;  %v1520_v28 = vmul.f32 0.03125, %v1515_v27 }
 0xf3f   :  { %v1522_v34 = vsub.f32 %v1509_v63, %v1520_v28 }
 0xf41   :  { %v1524_v42 = vmul.f32 %v1522_v34, %v1522_v34 }
 0xf43   :  { %v1526_v43 = vsel %vm140_vm8, %v1524_v42, 0.0 }
 0xf47   :  { %v2289_v5 = vpop.eup %2288 }
 0xf48   :  { %v1390_v33 = vsel %vm189_vm9, %v2289_v5, 0.0 }
 0xf49   :  { %1391 = vadd.xlane.f32.xlu0 %v1390_v33  ;;  %v2258_v33 = vld [vmem:[%s2878_s9 + $0x10] sm:$0xff]  }
 0xf5f   :  { %1400 = vrot.lane.b32.xlu0 %v2647_v36, %s2386_s27 }
 0xf75   :  { %v1326_v7 = vpop.f32.mrb[44].mxu1 }
 0xf76   :  { %v1332_v8 = vadd.f32 %v1326_v7, %v2732_v16  ;;  %v2190_v9 = vpop.f32.mrb[45].mxu1 }
 0xf77   :  { %v1329_v10 = vpop.f32.mrb[46].mxu1 }
 0xf78   :  { %v2191_v11 = vpop.f32.mrb[47].mxu1 }
 0xfd6   :  { %v1392_v12 = vpop.xlane.xlu0 %1391 }
 0xfd7   :  { %2290 = vrcp.f32 %v1392_v12 }
 0xfda   :  { %v1401_v13 = vpop.permute.xlu0 %1400 }
 0xfdb   :  { %v1406_v36 = vsel %vm258_vm10, %v1401_v13, 0 }
 0xfdc   :  { %2199 = vmatpush3.bf16.msra.mxu1 %v1406_v36 }
 0xfdd   :  { %2210 = vmatprep.subr.bf16.mxu1 %v2375_v0 }
 0xfe1   :  { %v2291_v14 = vpop.eup %2290 }
 0xfe2   :  { %v1394_v15 = vmul.f32 %v2291_v14, %v1392_v12 }
 0xfe4   :  { %v1395_v17 = vsub.f32 2.0, %v1394_v15 }
 0xfe6   :  { %v1396_v18 = vmul.f32 %v2291_v14, %v1395_v17 }
 0xfe8   :  { %v1397_v19 = vmul.f32 %v2289_v5, %v1396_v18 }
 0xfea   :  { %v1398_v20 = vadd.f32 %v1397_v19, %v1234_v45  ;;  %v1399_v21 = vpack.c.bf16 %v1397_v19, %v1397_v19 }
 0xfec   :  { %v1497_v22 = vmul.f32 0.25, %v1398_v20  ;;  %2201 = vmatmul.mubr.msk.bf16.vlgmr.msra.gmra.mrb[48].mxu1 %vm189_vm9, %v1399_v21 }
 0xfed   :  { %2214 = vmatprep.mubr.msk.bf16.mxu1 %vm2376_vm0, %v2375_v0  ;;  %2211 = vmatpush3.bf16.msra.mxu1 %v2254_v50 }
 0xfee   :  { %1499 = vst.msk [vmem:[#allocation6 + $0x8] sm:$0xff] %vm189_vm9, %v1497_v22  ;;  %2212 = vmatprep.subr.bf16.mxu1 %v2375_v0 }
 0xff1   :  { %2213 = vmatpush3.bf16.msra.mxu1 %v2255_v51 }
0x10bf   :  { %v1442_v16 = vpop.f32.mrb[48].mxu1 }
0x10c0   :  { %v1448_v23 = vpack.c.bf16 %v1442_v16, %v1442_v16  ;;  %v2202_v24 = vpop.f32.mrb[49].mxu1 }
0x10c1   :  { %v1445_v25 = vpop.f32.mrb[50].mxu1 }
0x10c2   :  { %v2203_v26 = vpop.f32.mrb[51].mxu1  ;;  %2207 = vmatmul.mubr.msk.bf16.vlgmr.msra.gmra.mrb[44].mxu0 %vm189_vm9, %v1448_v23 }
0x10c3   :  { %2226 = vmatprep.mubr.msk.bf16.mxu0 %vm2376_vm0, %v2375_v0 }
0x1195   :  { %v1490_v29 = vpop.f32.mrb[44].mxu0 }
0x1196   :  { %v1496_v30 = vadd.f32 %v1490_v29, %v1332_v8  ;;  %v2208_v31 = vpop.f32.mrb[45].mxu0 }
0x1197   :  { %v1493_v32 = vpop.f32.mrb[46].mxu0 }
0x1198   :  { %v1508_v37 = vadd.f32 %v1984_v55, %v1496_v30  ;;  %v2209_v39 = vpop.f32.mrb[47].mxu0 }
0x119a   :  { %v1510_v40 = vadd.f32 %v1508_v37, %v2537_v38  ;;  %v2256_v38 = vld [vmem:[%s2878_s9] sm:$0xff]   ;;  %s1940_s9 = sshll.u32 %s2387_s8, 4  ;;  %s1941_s9 = int_to_ptr.vmem [resolvable:$true] %s1940_s9 }
0x119b   :  { %2219 = vmatpush3.bf16.msra.mxu0 %v2256_v38  ;;  %p2327_p9 = scmp.lt.s32.totalorder %s1941_s9, %s1941_s9 }
0x119c   :  { %v1516_v41 = vsel %vm140_vm8, %v1510_v40, 0.0  ;;  %2220 = vmatprep.subr.bf16.mxu0 %v2375_v0 }
0x119d   :  { %1517 = vadd.xlane.f32.xlu1 %v1516_v41 }
0x119f   :  { %2221 = vmatpush3.bf16.msra.mxu0 %v2257_v52 }
0x11a0   :  { %2222 = vmatprep.subr.bf16.mxu0 %v2375_v0 }
0x11a1   :  { %1527 = vadd.xlane.f32.xlu1 %v1526_v43 }
0x11a3   :  { %2223 = vmatpush3.bf16.msra.mxu0 %v2258_v33 }
0x11a4   :  { %2224 = vmatprep.subr.bf16.mxu0 %v2375_v0  ;;  %v1991_v0 = vld [vmem:[%s2879_s10] ss:$0 sm:$0xff]  ;;  %s2322_s10 = scalar_lea.vmem %s1941_s9, 256 }
0x11a5   :  { %p2323_p8 = scmp.ne.s32.totalorder %s1941_s9, %s2322_s10  ;;  %p2328_p10 = scmp.lt.s32.totalorder %s2322_s10, %s2322_s10 }
0x11a7   :  { %2225 = vmatpush3.bf16.msra.mxu0 %v2259_v6  ;;  %p2329_p11 = por %p2328_p10, %p2327_p9 }
0x11a9   :  { %p2330_p12 = pnand %p2329_p11, %p2323_p8 }
0x122a   :  { %v1518_v45 = vpop.xlane.xlu1 %1517 }
0x122b   :  { %v1521_v46 = vmul.f32 0.03125, %v1518_v45 }
0x122d   :  { %v1523_v47 = vsub.f32 %v1510_v40, %v1521_v46 }
0x122e   :  { %v1528_v44 = vpop.xlane.xlu1 %1527 }
0x122f   :  { %v1525_v48 = vmul.f32 %v1523_v47, %v1523_v47  ;;  %v1532_v53 = vmul.f32 0.03125, %v1528_v44 }
0x1231   :  { %v1529_v49 = vsel %vm140_vm8, %v1525_v48, 0.0  ;;  %v1534_v54 = vadd.f32 1e-05, %v1532_v53 }
0x1232   :  { %1530 = vadd.xlane.f32.xlu1 %v1529_v49 }
0x1233   :  { %2292 = vrsqrt.f32 %v1534_v54 }
0x123d   :  { %v2293_v59 = vpop.eup %2292 }
0x123e   :  { %v1538_v60 = vmul.f32 %v2293_v59, %v1522_v34 }
0x1240   :  { %v1546_v62 = vmul.f32 %v1985_v61, %v1538_v60 }
0x1242   :  { %v1554_v3 = vadd.f32 %v1986_v1, %v1546_v62 }
0x12bf   :  { %v1531_v55 = vpop.xlane.xlu1 %1530 }
0x12c0   :  { %v1533_v56 = vmul.f32 0.03125, %v1531_v55 }
0x12c2   :  { %v1535_v58 = vadd.f32 1e-05, %v1533_v56 }
0x12c4   :  { %2294 = vrsqrt.f32 %v1535_v58 }
0x12ce   :  { %v2295_v57 = vpop.eup %2294 }
0x12cf   :  { %v1539_v63 = vmul.f32 %v2295_v57, %v1523_v47 }
0x12d1   :  { %v1547_v2 = vmul.f32 %v1985_v61, %v1539_v63 }
0x12d3   :  { %v1555_v4 = vadd.f32 %v1986_v1, %v1547_v2 }
0x12d5   :  { %v1556_v5 = vpack.c.bf16 %v1555_v4, %v1554_v3 }
0x12d7   :  { %2215 = vmatmul.mubr.msk.bf16.vlgmr.msra.gmra.mrb[52].mxu1 %vm140_vm8, %v1556_v5 }
0x13aa   :  { %v1617_v7 = vpop.f32.mrb[52].mxu1 }
0x13ab   :  { %v1618_v8 = vadd.f32 %v1987_v35, %v1617_v7  ;;  %v2216_v9 = vpop.f32.mrb[53].mxu1 }
0x13ac   :  { %v1620_v10 = vpop.f32.mrb[54].mxu1 }
0x13ad   :  { %v1621_v11 = vadd.f32 %v1987_v35, %v1620_v10  ;;  %v2217_v12 = vpop.f32.mrb[55].mxu1  ;;  %v1624_v13 = vmax.f32 %v1618_v8, 0.0 }
0x13af   :  { %v1625_v36 = vmax.f32 %v1621_v11, 0.0 }
0x13b1   :  { %v1626_v14 = vpack.c.bf16 %v1625_v36, %v1624_v13 }
0x13b3   :  { %2227 = vmatmul.mubr.msk.bf16.vlgmr.msra.gmra.mrb[48].mxu0 %vm1666_vm11, %v1626_v14 }
0x1486   :  { %v1704_v15 = vpop.f32.mrb[48].mxu0 }
0x1487   :  { %v2228_v17 = vpop.f32.mrb[49].mxu0  ;;  %v1705_v19 = vadd.f32 %v1991_v0, %v1704_v15 }
0x1488   :  { %v1707_v18 = vpop.f32.mrb[50].mxu0 }
0x1489   :  { %v1708_v20 = vadd.f32 %v1991_v0, %v1707_v18  ;;  %v2229_v21 = vpop.f32.mrb[51].mxu0  ;;  %v1711_v23 = vadd.f32 %v1705_v19, %v1554_v3 }
0x148b   :  { %v1712_v22 = vadd.f32 %v1708_v20, %v1555_v4  ;;  %v1715_v24 = vsel %vm140_vm8, %v1711_v23, 0.0 }
0x148d   :  { %v1718_v16 = vsel %vm140_vm8, %v1712_v22, 0.0 }
0x148e   :  { %1719 = vadd.xlane.f32.xlu1 %v1718_v16 }
0x1492   :  { %1716 = vadd.xlane.f32.xlu1 %v1715_v24 }
0x151b   :  { %v1720_v25 = vpop.xlane.xlu1 %1719 }
0x151c   :  { %v1722_v26 = vmul.f32 0.03125, %v1720_v25 }
0x151e   :  { %v1724_v27 = vsub.f32 %v1712_v22, %v1722_v26 }
0x151f   :  { %v1717_v28 = vpop.xlane.xlu1 %1716 }
0x1520   :  { %v1721_v29 = vmul.f32 0.03125, %v1717_v28  ;;  %v1726_v30 = vmul.f32 %v1724_v27, %v1724_v27 }
0x1522   :  { %v1723_v31 = vsub.f32 %v1711_v23, %v1721_v29  ;;  %v1730_v32 = vsel %vm140_vm8, %v1726_v30, 0.0 }
0x1523   :  { %1731 = vadd.xlane.f32.xlu0 %v1730_v32 }
0x1524   :  { %v1725_v34 = vmul.f32 %v1723_v31, %v1723_v31 }
0x1526   :  { %v1727_v37 = vsel %vm140_vm8, %v1725_v34, 0.0 }
0x1527   :  { %1728 = vadd.xlane.f32.xlu1 %v1727_v37 }
0x1528   :  { %2333 = shalt.err (!%p2330_p12)
}
0x1529   :  { %s2334_s16 = scalar_lea.hbm %s2883_s14, 256 }
0x152a   :  { %p2335_p13 = scmp.ne.s32.totalorder %s2883_s14, %s2334_s16  ;;  %p2338_p0 = scmp.lt.u32.totalorder %s2334_s16, %s2883_s14 }
0x152c   :  { %p2340_p1 = pnand %p2338_p0, %p2335_p13 }
0x152e   :  { %2343 = shalt.err (!%p2340_p1)
}
0x152f   :  { %s2388_s19 = smov 128   ;;  %s2389_s3 = smov 8   ;;  %v2390_v46 = vmov 1966171168   ;;  %v1762_v48 = vlaneseq  ;;  %v1997_v38 = vld [vmem:[%s2880_s11] ss:$0 sm:$0xff] }
0x1530   :  { %1946 = dma.vmem_to_hbm [thread:$0]  %s1941_s9, 256, %s2883_s14, [#allocation7], %s2388_s19, %s2388_s19, %s2389_s3   ;;  %v1760_v47 = vunpack.c.l.s4 %v2390_v46  ;;  %vm1905_vm12 = vcmask 1040384   ;;  %vm1914_vm13 = vcmask 254976  }
0x1531   :  { %v1763_v50 = vshrl.u32 %v1762_v48, 7  ;;  %v1998_v44 = vld [vmem:[%s2881_s12] ss:$0 sm:$0xff]  ;;  %s2391_s11 = smov [#allocation5]  }
0x1532   :  { %v1761_v49 = vunpack.c.0.s8 %v1760_v47  ;;  %s1928_s12 = sshll.u32 %s2391_s11, 4  ;;  %s1929_s12 = int_to_ptr.vmem [resolvable:$true] %s1928_s12 }
0x1533   :  { %v1867_v2 = vsub.s32 0, %v1763_v50  ;;  %s2344_s25 = scalar_lea.vmem %s1929_s12, 256  ;;  %p2349_p3 = scmp.lt.s32.totalorder %s1929_s12, %s1929_s12 }
0x1534   :  { %v1764_v53 = vsub.s32 %v1761_v49, %v1763_v50  ;;  %p2345_p2 = scmp.ne.s32.totalorder %s1929_s12, %s2344_s25  ;;  %p2350_p4 = scmp.lt.s32.totalorder %s2344_s25, %s2344_s25 }
0x1536   :  { %p2351_p5 = por %p2350_p4, %p2349_p3 }
0x1538   :  { %p2352_p6 = pnand %p2351_p5, %p2345_p2 }
0x15b0   :  { %v1732_v39 = vpop.xlane.xlu0 %1731 }
0x15b1   :  { %v1734_v40 = vmul.f32 0.03125, %v1732_v39 }
0x15b3   :  { %v1736_v41 = vadd.f32 1e-05, %v1734_v40 }
0x15b4   :  { %v1729_v42 = vpop.xlane.xlu1 %1728 }
0x15b5   :  { %2296 = vrsqrt.f32 %v1736_v41  ;;  %v1733_v43 = vmul.f32 0.03125, %v1729_v42 }
0x15b7   :  { %v1735_v45 = vadd.f32 1e-05, %v1733_v43 }
0x15b9   :  { %2298 = vrsqrt.f32 %v1735_v45 }
0x15bf   :  { %v2297_v51 = vpop.eup %2296 }
0x15c0   :  { %v1740_v52 = vmul.f32 %v2297_v51, %v1724_v27 }
0x15c2   :  { %v1748_v54 = vmul.f32 %v1997_v38, %v1740_v52 }
0x15c3   :  { %v2299_v55 = vpop.eup %2298 }
0x15c4   :  { %v1756_v56 = vadd.f32 %v1998_v44, %v1748_v54  ;;  %v1739_v58 = vmul.f32 %v2299_v55, %v1723_v31 }
0x15c6   :  { %v1816_v59 = vcombine.high %v1756_v56, %v1756_v56  ;;  %v1823_v60 = vrot.slane %v1756_v56, %v1764_v53  ;;  %v1747_v61 = vmul.f32 %v1997_v38, %v1739_v58 }
0x15c8   :  { %v1830_v57 = vrot.slane %v1816_v59, %v1764_v53  ;;  %v1831_v62 = vcombine.high %v1823_v60, %v1823_v60  ;;  %v1839_v63 = vrot.slane %v1823_v60, %v1764_v53  ;;  %v1755_v1 = vadd.f32 %v1998_v44, %v1747_v61 }
0x15ca   :  { %v1832_v3 = vcombine.high %v1830_v57, %v1830_v57  ;;  %v1846_v4 = vrot.slane %v1830_v57, %v1764_v53  ;;  %v1853_v5 = vrot.slane %v1831_v62, %v1764_v53  ;;  %v1861_v33 = vcombine.high %v1839_v63, %v1839_v63 }
0x15cb   :  { %v1758_v6 = vcombine.high %v1755_v1, %v1755_v1  ;;  %v1765_v35 = vrot.slane %v1755_v1, %v1764_v53  ;;  %v1868_v13 = vrot.slane %v1839_v63, %v1867_v2 }
0x15cc   :  { %v1860_v7 = vrot.slane %v1832_v3, %v1764_v53  ;;  %v1862_v8 = vcombine.high %v1846_v4, %v1846_v4  ;;  %v1863_v9 = vcombine.high %v1853_v5, %v1853_v5  ;;  %v1872_v36 = vrot.slane %v1853_v5, %v1867_v2 }
0x15cd   :  { %v1772_v10 = vrot.slane %v1758_v6, %v1764_v53  ;;  %v1773_v11 = vcombine.high %v1765_v35, %v1765_v35  ;;  %v1876_v14 = vrot.slane %v1861_v33, %v1867_v2  ;;  %v1781_v15 = vrot.slane %v1765_v35, %v1764_v53 }
0x15ce   :  { %v1864_v12 = vcombine.high %v1860_v7, %v1860_v7  ;;  %v1880_v19 = vrot.slane %v1863_v9, %v1867_v2  ;;  %v1884_v20 = vrot.slane %v1846_v4, %v1867_v2  ;;  %v1888_v21 = vrot.slane %v1860_v7, %v1867_v2 }
0x15cf   :  { %v1774_v0 = vcombine.high %v1772_v10, %v1772_v10  ;;  %v1788_v17 = vrot.slane %v1772_v10, %v1764_v53  ;;  %v1795_v18 = vrot.slane %v1773_v11, %v1764_v53  ;;  %v1892_v22 = vrot.slane %v1862_v8, %v1867_v2 }
0x15d0   :  { %v1803_v23 = vcombine.high %v1781_v15, %v1781_v15  ;;  %v1896_v26 = vrot.slane %v1864_v12, %v1867_v2  ;;  %v1906_v27 = vsel %vm1905_vm12, %v1781_v15, %v1868_v13 }
0x15d1   :  { %v1802_v16 = vrot.slane %v1774_v0, %v1764_v53  ;;  %v1804_v24 = vcombine.high %v1788_v17, %v1788_v17  ;;  %v1805_v25 = vcombine.high %v1795_v18, %v1795_v18  ;;  %v1907_v28 = vsel %vm1905_vm12, %v1795_v18, %v1872_v36  ;;  %1915 = vst.msk [vmem:[#allocation5] sm:$0x3] %vm1914_vm13, %v1906_v27 }
0x15d2   :  { %v1910_v29 = vsel %vm1905_vm12, %v1788_v17, %v1884_v20  ;;  %v1908_v31 = vsel %vm1905_vm12, %v1803_v23, %v1876_v14  ;;  %1916 = vst.msk [vmem:[#allocation5 + $0x2] sm:$0x3] %vm1914_vm13, %v1907_v28 }
0x15d3   :  { %v1806_v30 = vcombine.high %v1802_v16, %v1802_v16  ;;  %v1909_v32 = vsel %vm1905_vm12, %v1805_v25, %v1880_v19  ;;  %v1911_v34 = vsel %vm1905_vm12, %v1802_v16, %v1888_v21  ;;  %1919 = vst.msk [vmem:[#allocation5 + $0x8] sm:$0x3] %vm1914_vm13, %v1910_v29  ;;  %v1912_v37 = vsel %vm1905_vm12, %v1804_v24, %v1892_v22 }
0x15d4   :  { %1917 = vst.msk [vmem:[#allocation5 + $0x4] sm:$0x3] %vm1914_vm13, %v1908_v31  ;;  %1918 = vst.msk [vmem:[#allocation5 + $0x6] sm:$0x3] %vm1914_vm13, %v1909_v32 }
0x15d5   :  { %1920 = vst.msk [vmem:[#allocation5 + $0xa] sm:$0x3] %vm1914_vm13, %v1911_v34  ;;  %v1913_v39 = vsel %vm1905_vm12, %v1806_v30, %v1896_v26  ;;  %1921 = vst.msk [vmem:[#allocation5 + $0xc] sm:$0x3] %vm1914_vm13, %v1912_v37 }
0x15d6   :  { %1922 = vst.msk [vmem:[#allocation5 + $0xe] sm:$0x3] %vm1914_vm13, %v1913_v39 }
0x15d7   :  { %2355 = shalt.err (!%p2352_p6)
}
0x15d8   :  { %s2356_s27 = scalar_lea.hbm %s2882_s13, 256 }
0x15d9   :  { %p2357_p7 = scmp.ne.s32.totalorder %s2882_s13, %s2356_s27  ;;  %p2360_p8 = scmp.lt.u32.totalorder %s2356_s27, %s2882_s13 }
0x15db   :  { %p2362_p9 = pnand %p2360_p8, %p2357_p7 }
0x15dd   :  { %2365 = shalt.err (!%p2362_p9)
}
0x15de   :  { %s2392_s23 = smov 32   ;;  %s2393_s29 = smov 2  }
0x15df   :  { %1934 = dma.vmem_to_hbm [thread:$0]  %s1929_s12, 256, %s2882_s13, [#allocation4], %s2392_s23, %s2392_s23, %s2393_s29  }
0x15e0   :  { %2368 = dma.done.wait [#allocation4], 256  }
0x15e1   :  { %2369 = vsyncadd [#allocation4], 4294967040 }
0x15e2   :  { %2370 = dma.done.wait [#allocation7], 256  }
0x15e3   :  { %2371 = vsyncadd [#allocation7], 4294967040 }
0x15e4   :  { %1953 = vsyncpa [#allocation3], 1 }
0x15e5   :  { %1954 = vsyncpa [#allocation4], 1 }
0x15e6   :  { %1955 = vsyncpa [#allocation7], 1 }

</bundles_post_ra>
